<compile_context>
chip_gen: v7x
topology: tpu7x:2x2x1
jax: 0.10.0
libtpu: 0.0.40
codegen_flags: <defaults>
</compile_context>

<pallas_src>
import functools

import jax
import jax.numpy as jnp
import numpy as np
from jax import lax
from jax.experimental import pallas as pl
from jax.experimental.pallas import tpu as pltpu

_EPS = 1e-5
_LANES = 128
_SUBLANES = 8


# ---------------------------------------------------------------------------
# Fused kernel
# ---------------------------------------------------------------------------
def _fused_irb_kernel(x_ref, w1_ref, b1_ref, w2_ref, b2_ref, w3_ref, b3_ref,
                      wres_ref, o_ref, h_img,
                      *, ks, stride, pad, wl, th_out, h_in, w_in, wout,
                      hidp, coutp, use_skip):
    """One grid step = (batch b, output-row tile r)."""
    rblk = pl.program_id(1)
    cin = x_ref.shape[-1]
    h_s, w_s, _ = h_img.shape

    # ---- Phase 1 (once per batch element): 1x1 expand conv + BN1 + relu6 for
    # the whole image, written into the VMEM hidden image whose zero border
    # doubles as the depthwise conv's spatial padding.
    @pl.when(rblk == 0)
    def _():
        # Zero only the halo border; the interior is overwritten just below.
        if pad > 0:
            zrow = jnp.zeros((pad, w_s, hidp), h_img.dtype)
            h_img[0:pad, :, :] = zrow
            h_img[pad + h_in:, :, :] = zrow
            h_img[:, 0:wl, :] = jnp.zeros((h_s, wl, hidp), h_img.dtype)
            h_img[:, wl + w_in:, :] = jnp.zeros((h_s, pad, hidp), h_img.dtype)
        x = x_ref[0].reshape(h_in * w_in, cin)
        y = jnp.dot(x, w1_ref[...], preferred_element_type=jnp.float32)
        y = jnp.clip(y + b1_ref[...], 0.0, 6.0)
        # Interior store starts at column `wl` (a multiple of 8) -> sublane
        # aligned store of the largest tensor in the kernel.
        h_img[pad:pad + h_in, wl:wl + w_in, :] = (
            y.reshape(h_in, w_in, hidp).astype(h_img.dtype))

    # ---- Phase 2: depthwise ks x ks conv + BN2 + relu6 for this row tile.
    m = th_out * stride
    row0 = rblk * m
    align = m & (-m)                      # largest power-of-two divisor of m
    if align > 1:
        row0 = pl.multiple_of(row0, min(align, 128))
    th_in = (th_out - 1) * stride + ks

    # Load the input window once, convert to f32 once, hoist tap weights once;
    # all ks*ks taps are slices of this single value.
    win = h_img[pl.ds(row0, th_in), :, :].astype(jnp.float32)
    w2v = w2_ref[...]                                   # (ks*ks, hidp) f32
    acc = jnp.zeros((th_out, wout, hidp), jnp.float32)  # ~16 vregs for th*wout<=128
    col0 = wl - pad
    for kh in range(ks):
        for kw in range(ks):
            patch = lax.slice(
                win, (kh, col0 + kw, 0),
                (kh + (th_out - 1) * stride + 1,
                 col0 + kw + (wout - 1) * stride + 1, hidp),
                (stride, stride, 1))
            acc = acc + patch * w2v[kh * ks + kw]
    y2 = jnp.clip(acc + b2_ref[...], 0.0, 6.0)

    # ---- Phase 3: 1x1 project conv + BN3 (+ residual) + relu6, lane-dense
    # output write (coutp is a 128 multiple -> unmasked stores).
    y2 = y2.reshape(th_out * wout, hidp).astype(w3_ref.dtype)
    y3 = jnp.dot(y2, w3_ref[...], preferred_element_type=jnp.float32)
    y3 = y3 + b3_ref[...]
    if use_skip:
        # stride == 1 and cin == cout guaranteed by the wrapper; wres is a
        # zero-padded identity that scatters the residual into the lane-dense
        # coutp channels via a tiny MXU matmul.
        res = x_ref[0, pl.ds(rblk * th_out, th_out), :, :]
        res = res.reshape(th_out * wout, cin)
        y3 = y3 + jnp.dot(res, wres_ref[...],
                          preferred_element_type=jnp.float32)
    o_ref[0] = jnp.clip(y3, 0.0, 6.0).reshape(
        th_out, wout, coutp).astype(o_ref.dtype)


# ---------------------------------------------------------------------------
# Wrapper helpers
# ---------------------------------------------------------------------------
def _round_up(x, m):
    return (x + m - 1) // m * m


def _pad_to(a, shape):
    return jnp.pad(a, [(0, t - s) for s, t in zip(a.shape, shape)])


def _fold_bn(gamma, beta, mean, var):
    s = gamma / jnp.sqrt(var + _EPS)
    return s, beta - mean * s


def _pick_row_tile(hout, wout, stride, target_rows=128):
    """Largest divisor of hout giving ~target_rows rows of work per tile
    (register-resident accumulator), preferring 8-aligned row strides and
    >= 2 row tiles so output writeback pipelines."""
    target = max(1, target_rows // max(wout, 1))
    divs = [d for d in range(1, hout + 1) if hout % d == 0]
    th = 1
    for pred in (
            lambda d: d <= target and (d * stride) % 8 == 0 and (d * wout) % 8 == 0,
            lambda d: d <= target and (d * stride) % 8 == 0,
            lambda d: d <= target):
        cands = [d for d in divs if pred(d)]
        if cands:
            th = max(cands)
            break
    if th == hout and hout > 1:
        th = max(d for d in divs if d < hout)
    return th


def _preferred_compute_dtype(x_dtype):
    """bf16 compute on bf16-VALU parts (v6e/v7x); f32 elsewhere / non-f32 in."""
    if jnp.dtype(x_dtype) != jnp.dtype(jnp.float32):
        return jnp.dtype(x_dtype)
    try:
        kind = jax.devices()[0].device_kind.lower()
    except Exception:  # pragma: no cover - be conservative
        return jnp.dtype(x_dtype)
    for old in ('v2', 'v3', 'v4', 'v5'):
        if old in kind:
            return jnp.dtype(x_dtype)      # no bf16 VALU -> keep f32 compute
    return jnp.dtype(jnp.bfloat16)


def _vmem_block_bytes(shape, dtype):
    """VMEM footprint of one block, padded to (8, 128) tiles on last 2 dims."""
    isz = jnp.dtype(dtype).itemsize
    lead = 1
    for s in shape[:-2]:
        lead *= s
    return lead * _round_up(shape[-2], _SUBLANES) * _round_up(shape[-1], _LANES) * isz


# ---------------------------------------------------------------------------
# Wrapper
# ---------------------------------------------------------------------------
def inverted_residual_block(x_nchw, params, *, kernel_size=3, stride=1,
                            block_type='normal', compute_dtype=None):
    """Forward pass of InvertedResidualBlock.  Input/output are NCHW."""
    n, cin, h, w = x_nchw.shape
    hid = params['w1'].shape[0]
    cout = params['w3'].shape[0]
    ks = kernel_size
    p = ks // 2
    hout = (h + 2 * p - ks) // stride + 1
    wout = (w + 2 * p - ks) // stride + 1
    use_skip = (stride == 1 and cin == cout and block_type == 'skip')

    cdt = (_preferred_compute_dtype(x_nchw.dtype) if compute_dtype is None
           else jnp.dtype(compute_dtype))
    hidp = _round_up(hid, _LANES)          # lane-dense hidden channels
    coutp = _round_up(cout, _LANES)        # lane-dense output channels
    wl = _round_up(p, _SUBLANES) if p > 0 else 0   # left W margin (8-aligned)

    s1, t1 = _fold_bn(*params['bn1'])
    s2, t2 = _fold_bn(*params['bn2'])
    s3, t3 = _fold_bn(*params['bn3'])

    # Fold BN scales into conv weights; pad channel dims to 128 lanes.
    w1 = params['w1'].reshape(hid, cin).T * s1[None, :]             # (cin, hid)
    w1 = _pad_to(w1, (cin, hidp)).astype(cdt)
    b1 = _pad_to(t1.reshape(1, hid), (1, hidp)).astype(jnp.float32)

    w2 = params['w2'][:, 0] * s2[:, None, None]                     # (hid,k,k)
    w2 = jnp.transpose(w2, (1, 2, 0)).reshape(ks * ks, hid)
    w2 = _pad_to(w2, (ks * ks, hidp)).astype(jnp.float32)
    b2 = _pad_to(t2.reshape(1, hid), (1, hidp)).astype(jnp.float32)

    w3 = params['w3'].reshape(cout, hid).T * s3[None, :]            # (hid,cout)
    w3 = _pad_to(w3, (hidp, coutp)).astype(cdt)
    b3 = _pad_to(t3.reshape(1, cout), (1, coutp)).astype(jnp.float32)

    if use_skip:
        wres = _pad_to(jnp.eye(cin, dtype=jnp.float32), (cin, coutp)).astype(cdt)
    else:
        wres = jnp.zeros((cin, coutp), cdt)

    # NCHW -> NHWC (channels on the lane axis).
    x_nhwc = jnp.transpose(x_nchw, (0, 2, 3, 1)).astype(cdt)

    th = _pick_row_tile(hout, wout, stride)
    n_h = hout // th

    h_s = h + 2 * p                 # hidden scratch H (top/bottom halo)
    w_s = wl + w + p                # hidden scratch W (8-aligned left margin)

    kernel = functools.partial(
        _fused_irb_kernel, ks=ks, stride=stride, pad=p, wl=wl, th_out=th,
        h_in=h, w_in=w, wout=wout, hidp=hidp, coutp=coutp, use_skip=use_skip)

    # Explicit VMEM budget: double-buffered input/output blocks + weights +
    # the resident hidden scratch, with headroom, capped well below v7x's
    # 64 MiB per-core physical VMEM.
    vmem_need = (
        2 * _vmem_block_bytes((1, h, w, cin), cdt)
        + 2 * _vmem_block_bytes((1, th, wout, coutp), cdt)
        + 2 * (_vmem_block_bytes((cin, hidp), cdt)
               + 2 * _vmem_block_bytes((1, hidp), jnp.float32)
               + _vmem_block_bytes((ks * ks, hidp), jnp.float32)
               + _vmem_block_bytes((hidp, coutp), cdt)
               + _vmem_block_bytes((1, coutp), jnp.float32)
               + _vmem_block_bytes((cin, coutp), cdt))
        + _vmem_block_bytes((h_s, w_s, hidp), cdt))
    vmem_limit = int(min(48 * 1024 * 1024,
                         max(8 * 1024 * 1024,
                             int(vmem_need * 1.5) + (2 << 20))))

    flops = n * (2 * h * w * cin * hid
                 + 2 * hout * wout * hid * ks * ks
                 + 2 * hout * wout * hid * cout
                 + (2 * hout * wout * cin * cout if use_skip else 0))
    bytes_accessed = (
        int(x_nhwc.size) * x_nhwc.dtype.itemsize
        + n * hout * wout * coutp * jnp.dtype(cdt).itemsize
        + sum(int(a.size) * a.dtype.itemsize
              for a in (w1, b1, w2, b2, w3, b3, wres)))

    out_nhwc = pl.pallas_call(
        kernel,
        out_shape=jax.ShapeDtypeStruct((n, hout, wout, coutp), cdt),
        grid=(n, n_h),
        in_specs=[
            # whole input image per batch element (same block across row tiles
            # -> DMA'd once per batch); also supplies the residual rows.
            pl.BlockSpec((1, h, w, cin), lambda b, r: (b, 0, 0, 0)),
            pl.BlockSpec((cin, hidp), lambda b, r: (0, 0)),
            pl.BlockSpec((1, hidp), lambda b, r: (0, 0)),
            pl.BlockSpec((ks * ks, hidp), lambda b, r: (0, 0)),
            pl.BlockSpec((1, hidp), lambda b, r: (0, 0)),
            pl.BlockSpec((hidp, coutp), lambda b, r: (0, 0)),
            pl.BlockSpec((1, coutp), lambda b, r: (0, 0)),
            pl.BlockSpec((cin, coutp), lambda b, r: (0, 0)),
        ],
        # Lane-dense output (coutp lanes); sliced back to cout in the wrapper.
        out_specs=pl.BlockSpec((1, th, wout, coutp), lambda b, r: (b, r, 0, 0)),
        # Padded hidden image lives here for the whole block; never hits HBM.
        scratch_shapes=[pltpu.VMEM((h_s, w_s, hidp), cdt)],
        compiler_params=pltpu.CompilerParams(
            dimension_semantics=("parallel", "arbitrary"),
            vmem_limit_bytes=vmem_limit),
        cost_estimate=pl.CostEstimate(flops=int(flops), transcendentals=0,
                                      bytes_accessed=int(bytes_accessed)),
    )(x_nhwc, w1, b1, w2, b2, w3, b3, wres)

    # Channel slice fuses with the NHWC -> NCHW transpose in XLA.
    out = out_nhwc[..., :cout]
    return jnp.transpose(out, (0, 3, 1, 2)).astype(x_nchw.dtype)


# ---------------------------------------------------------------------------
# Plain-JAX reference (mirrors the PyTorch forward, eval-mode BN)
# ---------------------------------------------------------------------------
def _reference(x, params, *, kernel_size, stride, block_type):
    def bn(y, gamma, beta, mean, var):
        inv = 1.0 / jnp.sqrt(var + _EPS)
        return ((y - mean[None, :, None, None]) * inv[None, :, None, None]
                * gamma[None, :, None, None] + beta[None, :, None, None])

    hid = params['w1'].shape[0]
    p = kernel_size // 2
    out = lax.conv_general_dilated(x, params['w1'], (1, 1), 'VALID')
    out = jnp.clip(bn(out, *params['bn1']), 0.0, 6.0)
    out = lax.conv_general_dilated(out, params['w2'], (stride, stride),
                                   [(p, p), (p, p)], feature_group_count=hid)
    out = jnp.clip(bn(out, *params['bn2']), 0.0, 6.0)
    out = lax.conv_general_dilated(out, params['w3'], (1, 1), 'VALID')
    out = bn(out, *params['bn3'])
    if (stride == 1 and params['w1'].shape[1] == params['w3'].shape[0]
            and block_type == 'skip'):
        out = out + x
    return jnp.clip(out, 0.0, 6.0)


# ---------------------------------------------------------------------------
if __name__ == "__main__":
    in_planes, out_planes = 8, 8
    expansion = 2
    hidden = int(round(in_planes * expansion))        # 16
    kernel_size, stride = 3, 1
    N, H, W = 2, 16, 16

    key = jax.random.PRNGKey(0)
    keys = jax.random.split(key, 13)

    def bn_params(k0, k1, k2, k3, c):
        gamma = 1.0 + 0.1 * jax.random.normal(k0, (c,), jnp.float32)
        beta = 0.1 * jax.random.normal(k1, (c,), jnp.float32)
        mean = 0.1 * jax.random.normal(k2, (c,), jnp.float32)
        var = 0.5 + jnp.abs(jax.random.normal(k3, (c,), jnp.float32))
        return (gamma, beta, mean, var)

    params = {
        'w1': 0.1 * jax.random.normal(keys[0], (hidden, in_planes, 1, 1),
                                      jnp.float32),
        'w2': 0.1 * jax.random.normal(keys[1], (hidden, 1, kernel_size,
                                                kernel_size), jnp.float32),
        'w3': 0.1 * jax.random.normal(keys[2], (out_planes, hidden, 1, 1),
                                      jnp.float32),
        'bn1': bn_params(keys[3], keys[4], keys[5], keys[6], hidden),
        'bn2': bn_params(keys[7], keys[8], keys[9], keys[10], hidden),
        'bn3': bn_params(keys[11], keys[12], keys[3], keys[4], out_planes),
    }

    x = jax.random.normal(keys[5], (N, in_planes, H, W), jnp.float32)

    # f32 path (tight check) for both residual variants.
    for btype in ('skip', 'normal'):
        out = inverted_residual_block(x, params, kernel_size=kernel_size,
                                      stride=stride, block_type=btype,
                                      compute_dtype=jnp.float32)
        out = jax.block_until_ready(out)
        ref = _reference(x, params, kernel_size=kernel_size, stride=stride,
                         block_type=btype)
        assert out.shape == ref.shape, (out.shape, ref.shape)
        assert np.allclose(np.asarray(out), np.asarray(ref),
                           atol=1e-2, rtol=1e-2), btype

    # bf16 compute path (halves hidden-scratch VMEM and phase-2 traffic);
    # f32 MXU / tap accumulation, looser tolerance vs the f32 reference.
    out_bf16 = inverted_residual_block(x, params, kernel_size=kernel_size,
                                       stride=stride, block_type='skip',
                                       compute_dtype=jnp.bfloat16)
    out_bf16 = jax.block_until_ready(out_bf16)
    ref = _reference(x, params, kernel_size=kernel_size, stride=stride,
                     block_type='skip')
    assert np.allclose(np.asarray(out_bf16), np.asarray(ref),
                       atol=1e-1, rtol=1e-1)

    # Auto compute-dtype path (bf16 on v6e/v7x, f32 otherwise).
    out_auto = inverted_residual_block(x, params, kernel_size=kernel_size,
                                       stride=stride, block_type='skip')
    out_auto = jax.block_until_ready(out_auto)
    assert np.allclose(np.asarray(out_auto), np.asarray(ref),
                       atol=1e-1, rtol=1e-1)

    print("KERNEL_OK")
</pallas_src>

<mosaic_0001>
module attributes {stable_mosaic.version = 11 : i64} {
  func.func @_fused_irb_kernel(%arg0: i32, %arg1: i32, %arg2: memref<1x16x16x8xf32, #tpu.memory_space<vmem>>, %arg3: memref<8x128xf32, #tpu.memory_space<vmem>>, %arg4: memref<1x128xf32, #tpu.memory_space<vmem>>, %arg5: memref<9x128xf32, #tpu.memory_space<vmem>>, %arg6: memref<1x128xf32, #tpu.memory_space<vmem>>, %arg7: memref<128x128xf32, #tpu.memory_space<vmem>>, %arg8: memref<1x128xf32, #tpu.memory_space<vmem>>, %arg9: memref<8x128xf32, #tpu.memory_space<vmem>>, %arg10: memref<1x8x16x128xf32, #tpu.memory_space<vmem>>, %arg11: memref<18x25x128xf32, #tpu.memory_space<vmem>>) attributes {dimension_semantics = [#tpu.dimension_semantics<parallel>, #tpu.dimension_semantics<arbitrary>], iteration_bounds = array<i64: 2, 2>, scalar_prefetch = 0 : i64, scratch_operands = 1 : i64, tpu.core_type = #tpu.core_type<tc>, window_params = [{transform_indices = @transform_0, window_bounds = array<i64: 1, 16, 16, 8>}, {pipeline_mode = #tpu.pipeline_mode<synchronous>, transform_indices = @transform_1, window_bounds = array<i64: 8, 128>}, {pipeline_mode = #tpu.pipeline_mode<synchronous>, transform_indices = @transform_2, window_bounds = array<i64: 1, 128>}, {pipeline_mode = #tpu.pipeline_mode<synchronous>, transform_indices = @transform_3, window_bounds = array<i64: 9, 128>}, {pipeline_mode = #tpu.pipeline_mode<synchronous>, transform_indices = @transform_4, window_bounds = array<i64: 1, 128>}, {pipeline_mode = #tpu.pipeline_mode<synchronous>, transform_indices = @transform_5, window_bounds = array<i64: 128, 128>}, {pipeline_mode = #tpu.pipeline_mode<synchronous>, transform_indices = @transform_6, window_bounds = array<i64: 1, 128>}, {pipeline_mode = #tpu.pipeline_mode<synchronous>, transform_indices = @transform_7, window_bounds = array<i64: 8, 128>}, {transform_indices = @transform_8, window_bounds = array<i64: 1, 8, 16, 128>}]} {
    %c0_i32 = arith.constant 0 : i32
    %0 = arith.cmpi eq, %arg1, %c0_i32 : i32
    %1 = arith.extui %0 : i1 to i32
    %c0_i32_0 = arith.constant 0 : i32
    %2 = arith.cmpi ne, %1, %c0_i32_0 : i32
    scf.if %2 {
      %cst_26 = arith.constant 0.000000e+00 : f32
      %102 = vector.broadcast %cst_26 : f32 to vector<1x25x128xf32>
      %c0_27 = arith.constant 0 : index
      %c0_28 = arith.constant 0 : index
      %c0_29 = arith.constant 0 : index
      %103 = vector.load %arg11[%c0_27, %c0_28, %c0_29] : memref<18x25x128xf32, #tpu.memory_space<vmem>>, vector<1x25x128xf32>
      tpu.vector_store %arg11[%c0_27, %c0_28, %c0_29], %102 {strides = array<i32>} : memref<18x25x128xf32, #tpu.memory_space<vmem>>, vector<1x25x128xf32>,
      %c17 = arith.constant 17 : index
      %c0_30 = arith.constant 0 : index
      %c0_31 = arith.constant 0 : index
      %104 = vector.load %arg11[%c17, %c0_30, %c0_31] : memref<18x25x128xf32, #tpu.memory_space<vmem>>, vector<1x25x128xf32>
      tpu.vector_store %arg11[%c17, %c0_30, %c0_31], %102 {strides = array<i32>} : memref<18x25x128xf32, #tpu.memory_space<vmem>>, vector<1x25x128xf32>,
      %cst_32 = arith.constant 0.000000e+00 : f32
      %105 = vector.broadcast %cst_32 : f32 to vector<18x8x128xf32>
      %c0_33 = arith.constant 0 : index
      %c0_34 = arith.constant 0 : index
      %c0_35 = arith.constant 0 : index
      %106 = vector.load %arg11[%c0_33, %c0_34, %c0_35] : memref<18x25x128xf32, #tpu.memory_space<vmem>>, vector<18x8x128xf32>
      tpu.vector_store %arg11[%c0_33, %c0_34, %c0_35], %105 {strides = array<i32>} : memref<18x25x128xf32, #tpu.memory_space<vmem>>, vector<18x8x128xf32>,
      %cst_36 = arith.constant 0.000000e+00 : f32
      %107 = vector.broadcast %cst_36 : f32 to vector<18x1x128xf32>
      %c0_37 = arith.constant 0 : index
      %c24 = arith.constant 24 : index
      %c0_38 = arith.constant 0 : index
      %108 = vector.load %arg11[%c0_37, %c24, %c0_38] : memref<18x25x128xf32, #tpu.memory_space<vmem>>, vector<18x1x128xf32>
      tpu.vector_store %arg11[%c0_37, %c24, %c0_38], %107 {strides = array<i32>} : memref<18x25x128xf32, #tpu.memory_space<vmem>>, vector<18x1x128xf32>,
      %c0_39 = arith.constant 0 : index
      %c0_40 = arith.constant 0 : index
      %c0_41 = arith.constant 0 : index
      %c0_42 = arith.constant 0 : index
      %109 = vector.load %arg2[%c0_39, %c0_40, %c0_41, %c0_42] : memref<1x16x16x8xf32, #tpu.memory_space<vmem>>, vector<1x16x16x8xf32>
      %110 = vector.shape_cast %109 : vector<1x16x16x8xf32> to vector<16x16x8xf32>
      %111 = vector.shape_cast %110 : vector<16x16x8xf32> to vector<256x8xf32>
      %c0_43 = arith.constant 0 : index
      %c0_44 = arith.constant 0 : index
      %112 = vector.load %arg3[%c0_43, %c0_44] : memref<8x128xf32, #tpu.memory_space<vmem>>, vector<8x128xf32>
      %cst_45 = arith.constant dense<0.000000e+00> : vector<256x128xf32>
      %113 = tpu.matmul %111, %112, %cst_45 {dimension_numbers = #tpu.dot_dimension_numbers<[1], [0], [0], [1], [0, 0, 1, 1], [], []>} : vector<256x8xf32>, vector<8x128xf32>, vector<256x128xf32> -> vector<256x128xf32>
      %c0_46 = arith.constant 0 : index
      %c0_47 = arith.constant 0 : index
      %114 = vector.load %arg4[%c0_46, %c0_47] : memref<1x128xf32, #tpu.memory_space<vmem>>, vector<1x128xf32>
      %115 = vector.broadcast %114 : vector<1x128xf32> to vector<256x128xf32>
      %116 = arith.addf %113, %115 : vector<256x128xf32>
      %cst_48 = arith.constant 0.000000e+00 : f32
      %cst_49 = arith.constant 6.000000e+00 : f32
      %117 = vector.broadcast %cst_48 : f32 to vector<256x128xf32>
      %118 = arith.maximumf %117, %116 : vector<256x128xf32>
      %119 = vector.broadcast %cst_49 : f32 to vector<256x128xf32>
      %120 = arith.minimumf %119, %118 : vector<256x128xf32>
      %121 = vector.shape_cast %120 : vector<256x128xf32> to vector<16x16x128xf32>
      %c1 = arith.constant 1 : index
      %c8 = arith.constant 8 : index
      %c0_50 = arith.constant 0 : index
      %122 = vector.load %arg11[%c1, %c8, %c0_50] : memref<18x25x128xf32, #tpu.memory_space<vmem>>, vector<16x16x128xf32>
      tpu.vector_store %arg11[%c1, %c8, %c0_50], %121 {strides = array<i32>} : memref<18x25x128xf32, #tpu.memory_space<vmem>>, vector<16x16x128xf32>,
    } else {
    }
    %c8_i32 = arith.constant 8 : i32
    %3 = arith.muli %arg1, %c8_i32 : i32
    %4 = tpu.assume_multiple %3, 8 : i32
    %5 = arith.index_cast %4 : i32 to index
    %c0 = arith.constant 0 : index
    %c0_1 = arith.constant 0 : index
    %6 = vector.load %arg11[%5, %c0, %c0_1] : memref<18x25x128xf32, #tpu.memory_space<vmem>>, vector<10x25x128xf32>
    %c0_2 = arith.constant 0 : index
    %c0_3 = arith.constant 0 : index
    %7 = vector.load %arg5[%c0_2, %c0_3] : memref<9x128xf32, #tpu.memory_space<vmem>>, vector<9x128xf32>
    %cst = arith.constant 0.000000e+00 : f32
    %8 = vector.broadcast %cst : f32 to vector<8x16x128xf32>
    %9 = vector.extract_strided_slice %6 {offsets = [0, 7, 0], sizes = [8, 16, 128], strides = [1, 1, 1]} : vector<10x25x128xf32> to vector<8x16x128xf32>
    %10 = vector.extract_strided_slice %7 {offsets = [0, 0], sizes = [1, 128], strides = [1, 1]} : vector<9x128xf32> to vector<1x128xf32>
    %11 = vector.shape_cast %10 : vector<1x128xf32> to vector<128xf32>
    %12 = vector.shape_cast %11 : vector<128xf32> to vector<1x1x128xf32>
    %13 = vector.broadcast %12 : vector<1x1x128xf32> to vector<8x16x128xf32>
    %14 = arith.mulf %9, %13 : vector<8x16x128xf32>
    %15 = arith.addf %8, %14 : vector<8x16x128xf32>
    %16 = vector.extract_strided_slice %6 {offsets = [0, 8, 0], sizes = [8, 16, 128], strides = [1, 1, 1]} : vector<10x25x128xf32> to vector<8x16x128xf32>
    %17 = vector.extract_strided_slice %7 {offsets = [1, 0], sizes = [1, 128], strides = [1, 1]} : vector<9x128xf32> to vector<1x128xf32>
    %18 = vector.shape_cast %17 : vector<1x128xf32> to vector<128xf32>
    %19 = vector.shape_cast %18 : vector<128xf32> to vector<1x1x128xf32>
    %20 = vector.broadcast %19 : vector<1x1x128xf32> to vector<8x16x128xf32>
    %21 = arith.mulf %16, %20 : vector<8x16x128xf32>
    %22 = arith.addf %15, %21 : vector<8x16x128xf32>
    %23 = vector.extract_strided_slice %6 {offsets = [0, 9, 0], sizes = [8, 16, 128], strides = [1, 1, 1]} : vector<10x25x128xf32> to vector<8x16x128xf32>
    %24 = vector.extract_strided_slice %7 {offsets = [2, 0], sizes = [1, 128], strides = [1, 1]} : vector<9x128xf32> to vector<1x128xf32>
    %25 = vector.shape_cast %24 : vector<1x128xf32> to vector<128xf32>
    %26 = vector.shape_cast %25 : vector<128xf32> to vector<1x1x128xf32>
    %27 = vector.broadcast %26 : vector<1x1x128xf32> to vector<8x16x128xf32>
    %28 = arith.mulf %23, %27 : vector<8x16x128xf32>
    %29 = arith.addf %22, %28 : vector<8x16x128xf32>
    %30 = vector.extract_strided_slice %6 {offsets = [1, 7, 0], sizes = [8, 16, 128], strides = [1, 1, 1]} : vector<10x25x128xf32> to vector<8x16x128xf32>
    %31 = vector.extract_strided_slice %7 {offsets = [3, 0], sizes = [1, 128], strides = [1, 1]} : vector<9x128xf32> to vector<1x128xf32>
    %32 = vector.shape_cast %31 : vector<1x128xf32> to vector<128xf32>
    %33 = vector.shape_cast %32 : vector<128xf32> to vector<1x1x128xf32>
    %34 = vector.broadcast %33 : vector<1x1x128xf32> to vector<8x16x128xf32>
    %35 = arith.mulf %30, %34 : vector<8x16x128xf32>
    %36 = arith.addf %29, %35 : vector<8x16x128xf32>
    %37 = vector.extract_strided_slice %6 {offsets = [1, 8, 0], sizes = [8, 16, 128], strides = [1, 1, 1]} : vector<10x25x128xf32> to vector<8x16x128xf32>
    %38 = vector.extract_strided_slice %7 {offsets = [4, 0], sizes = [1, 128], strides = [1, 1]} : vector<9x128xf32> to vector<1x128xf32>
    %39 = vector.shape_cast %38 : vector<1x128xf32> to vector<128xf32>
    %40 = vector.shape_cast %39 : vector<128xf32> to vector<1x1x128xf32>
    %41 = vector.broadcast %40 : vector<1x1x128xf32> to vector<8x16x128xf32>
    %42 = arith.mulf %37, %41 : vector<8x16x128xf32>
    %43 = arith.addf %36, %42 : vector<8x16x128xf32>
    %44 = vector.extract_strided_slice %6 {offsets = [1, 9, 0], sizes = [8, 16, 128], strides = [1, 1, 1]} : vector<10x25x128xf32> to vector<8x16x128xf32>
    %45 = vector.extract_strided_slice %7 {offsets = [5, 0], sizes = [1, 128], strides = [1, 1]} : vector<9x128xf32> to vector<1x128xf32>
    %46 = vector.shape_cast %45 : vector<1x128xf32> to vector<128xf32>
    %47 = vector.shape_cast %46 : vector<128xf32> to vector<1x1x128xf32>
    %48 = vector.broadcast %47 : vector<1x1x128xf32> to vector<8x16x128xf32>
    %49 = arith.mulf %44, %48 : vector<8x16x128xf32>
    %50 = arith.addf %43, %49 : vector<8x16x128xf32>
    %51 = vector.extract_strided_slice %6 {offsets = [2, 7, 0], sizes = [8, 16, 128], strides = [1, 1, 1]} : vector<10x25x128xf32> to vector<8x16x128xf32>
    %52 = vector.extract_strided_slice %7 {offsets = [6, 0], sizes = [1, 128], strides = [1, 1]} : vector<9x128xf32> to vector<1x128xf32>
    %53 = vector.shape_cast %52 : vector<1x128xf32> to vector<128xf32>
    %54 = vector.shape_cast %53 : vector<128xf32> to vector<1x1x128xf32>
    %55 = vector.broadcast %54 : vector<1x1x128xf32> to vector<8x16x128xf32>
    %56 = arith.mulf %51, %55 : vector<8x16x128xf32>
    %57 = arith.addf %50, %56 : vector<8x16x128xf32>
    %58 = vector.extract_strided_slice %6 {offsets = [2, 8, 0], sizes = [8, 16, 128], strides = [1, 1, 1]} : vector<10x25x128xf32> to vector<8x16x128xf32>
    %59 = vector.extract_strided_slice %7 {offsets = [7, 0], sizes = [1, 128], strides = [1, 1]} : vector<9x128xf32> to vector<1x128xf32>
    %60 = vector.shape_cast %59 : vector<1x128xf32> to vector<128xf32>
    %61 = vector.shape_cast %60 : vector<128xf32> to vector<1x1x128xf32>
    %62 = vector.broadcast %61 : vector<1x1x128xf32> to vector<8x16x128xf32>
    %63 = arith.mulf %58, %62 : vector<8x16x128xf32>
    %64 = arith.addf %57, %63 : vector<8x16x128xf32>
    %65 = vector.extract_strided_slice %6 {offsets = [2, 9, 0], sizes = [8, 16, 128], strides = [1, 1, 1]} : vector<10x25x128xf32> to vector<8x16x128xf32>
    %66 = vector.extract_strided_slice %7 {offsets = [8, 0], sizes = [1, 128], strides = [1, 1]} : vector<9x128xf32> to vector<1x128xf32>
    %67 = vector.shape_cast %66 : vector<1x128xf32> to vector<128xf32>
    %68 = vector.shape_cast %67 : vector<128xf32> to vector<1x1x128xf32>
    %69 = vector.broadcast %68 : vector<1x1x128xf32> to vector<8x16x128xf32>
    %70 = arith.mulf %65, %69 : vector<8x16x128xf32>
    %71 = arith.addf %64, %70 : vector<8x16x128xf32>
    %c0_4 = arith.constant 0 : index
    %c0_5 = arith.constant 0 : index
    %72 = vector.load %arg6[%c0_4, %c0_5] : memref<1x128xf32, #tpu.memory_space<vmem>>, vector<1x128xf32>
    %73 = vector.shape_cast %72 : vector<1x128xf32> to vector<1x1x128xf32>
    %74 = vector.broadcast %73 : vector<1x1x128xf32> to vector<8x16x128xf32>
    %75 = arith.addf %71, %74 : vector<8x16x128xf32>
    %cst_6 = arith.constant 0.000000e+00 : f32
    %cst_7 = arith.constant 6.000000e+00 : f32
    %76 = vector.broadcast %cst_6 : f32 to vector<8x16x128xf32>
    %77 = arith.maximumf %76, %75 : vector<8x16x128xf32>
    %78 = vector.broadcast %cst_7 : f32 to vector<8x16x128xf32>
    %79 = arith.minimumf %78, %77 : vector<8x16x128xf32>
    %80 = vector.shape_cast %79 : vector<8x16x128xf32> to vector<128x128xf32>
    %c0_8 = arith.constant 0 : index
    %c0_9 = arith.constant 0 : index
    %81 = vector.load %arg7[%c0_8, %c0_9] : memref<128x128xf32, #tpu.memory_space<vmem>>, vector<128x128xf32>
    %cst_10 = arith.constant dense<0.000000e+00> : vector<128x128xf32>
    %82 = tpu.matmul %80, %81, %cst_10 {dimension_numbers = #tpu.dot_dimension_numbers<[1], [0], [0], [1], [0, 0, 1, 1], [], []>} : vector<128x128xf32>, vector<128x128xf32>, vector<128x128xf32> -> vector<128x128xf32>
    %c0_11 = arith.constant 0 : index
    %c0_12 = arith.constant 0 : index
    %83 = vector.load %arg8[%c0_11, %c0_12] : memref<1x128xf32, #tpu.memory_space<vmem>>, vector<1x128xf32>
    %84 = vector.broadcast %83 : vector<1x128xf32> to vector<128x128xf32>
    %85 = arith.addf %82, %84 : vector<128x128xf32>
    %c8_i32_13 = arith.constant 8 : i32
    %86 = arith.muli %arg1, %c8_i32_13 : i32
    %c0_14 = arith.constant 0 : index
    %87 = arith.index_cast %86 : i32 to index
    %c0_15 = arith.constant 0 : index
    %c0_16 = arith.constant 0 : index
    %88 = vector.load %arg2[%c0_14, %87, %c0_15, %c0_16] : memref<1x16x16x8xf32, #tpu.memory_space<vmem>>, vector<1x8x16x8xf32>
    %89 = vector.shape_cast %88 : vector<1x8x16x8xf32> to vector<8x16x8xf32>
    %90 = vector.shape_cast %89 : vector<8x16x8xf32> to vector<128x8xf32>
    %c0_17 = arith.constant 0 : index
    %c0_18 = arith.constant 0 : index
    %91 = vector.load %arg9[%c0_17, %c0_18] : memref<8x128xf32, #tpu.memory_space<vmem>>, vector<8x128xf32>
    %cst_19 = arith.constant dense<0.000000e+00> : vector<128x128xf32>
    %92 = tpu.matmul %90, %91, %cst_19 {dimension_numbers = #tpu.dot_dimension_numbers<[1], [0], [0], [1], [0, 0, 1, 1], [], []>} : vector<128x8xf32>, vector<8x128xf32>, vector<128x128xf32> -> vector<128x128xf32>
    %93 = arith.addf %85, %92 : vector<128x128xf32>
    %cst_20 = arith.constant 0.000000e+00 : f32
    %cst_21 = arith.constant 6.000000e+00 : f32
    %94 = vector.broadcast %cst_20 : f32 to vector<128x128xf32>
    %95 = arith.maximumf %94, %93 : vector<128x128xf32>
    %96 = vector.broadcast %cst_21 : f32 to vector<128x128xf32>
    %97 = arith.minimumf %96, %95 : vector<128x128xf32>
    %98 = vector.shape_cast %97 : vector<128x128xf32> to vector<8x16x128xf32>
    %c0_22 = arith.constant 0 : index
    %c0_23 = arith.constant 0 : index
    %c0_24 = arith.constant 0 : index
    %c0_25 = arith.constant 0 : index
    %99 = vector.load %arg10[%c0_22, %c0_23, %c0_24, %c0_25] : memref<1x8x16x128xf32, #tpu.memory_space<vmem>>, vector<1x8x16x128xf32>
    %100 = vector.shape_cast %99 : vector<1x8x16x128xf32> to vector<8x16x128xf32>
    %101 = vector.shape_cast %98 : vector<8x16x128xf32> to vector<1x8x16x128xf32>
    tpu.vector_store %arg10[%c0_22, %c0_23, %c0_24, %c0_25], %101 {strides = array<i32>} : memref<1x8x16x128xf32, #tpu.memory_space<vmem>>, vector<1x8x16x128xf32>,
    return
  }
  func.func @transform_0(%arg0: i32, %arg1: i32) -> (i32, i32, i32, i32) {
    %c0_i32 = arith.constant 0 : i32
    %c0_i32_0 = arith.constant 0 : i32
    %c0_i32_1 = arith.constant 0 : i32
    %c0_i32_2 = arith.constant 0 : i32
    return %arg0, %c0_i32, %c0_i32_0, %c0_i32_1 : i32, i32, i32, i32
  }
  func.func @transform_1(%arg0: i32, %arg1: i32) -> (i32, i32) {
    %c0_i32 = arith.constant 0 : i32
    %c0_i32_0 = arith.constant 0 : i32
    %c0_i32_1 = arith.constant 0 : i32
    return %c0_i32, %c0_i32_0 : i32, i32
  }
  func.func @transform_2(%arg0: i32, %arg1: i32) -> (i32, i32) {
    %c0_i32 = arith.constant 0 : i32
    %c0_i32_0 = arith.constant 0 : i32
    %c0_i32_1 = arith.constant 0 : i32
    return %c0_i32, %c0_i32_0 : i32, i32
  }
  func.func @transform_3(%arg0: i32, %arg1: i32) -> (i32, i32) {
    %c0_i32 = arith.constant 0 : i32
    %c0_i32_0 = arith.constant 0 : i32
    %c0_i32_1 = arith.constant 0 : i32
    return %c0_i32, %c0_i32_0 : i32, i32
  }
  func.func @transform_4(%arg0: i32, %arg1: i32) -> (i32, i32) {
    %c0_i32 = arith.constant 0 : i32
    %c0_i32_0 = arith.constant 0 : i32
    %c0_i32_1 = arith.constant 0 : i32
    return %c0_i32, %c0_i32_0 : i32, i32
  }
  func.func @transform_5(%arg0: i32, %arg1: i32) -> (i32, i32) {
    %c0_i32 = arith.constant 0 : i32
    %c0_i32_0 = arith.constant 0 : i32
    %c0_i32_1 = arith.constant 0 : i32
    return %c0_i32, %c0_i32_0 : i32, i32
  }
  func.func @transform_6(%arg0: i32, %arg1: i32) -> (i32, i32) {
    %c0_i32 = arith.constant 0 : i32
    %c0_i32_0 = arith.constant 0 : i32
    %c0_i32_1 = arith.constant 0 : i32
    return %c0_i32, %c0_i32_0 : i32, i32
  }
  func.func @transform_7(%arg0: i32, %arg1: i32) -> (i32, i32) {
    %c0_i32 = arith.constant 0 : i32
    %c0_i32_0 = arith.constant 0 : i32
    %c0_i32_1 = arith.constant 0 : i32
    return %c0_i32, %c0_i32_0 : i32, i32
  }
  func.func @transform_8(%arg0: i32, %arg1: i32) -> (i32, i32, i32, i32) {
    %c0_i32 = arith.constant 0 : i32
    %c0_i32_0 = arith.constant 0 : i32
    %c0_i32_1 = arith.constant 0 : i32
    return %arg0, %arg1, %c0_i32, %c0_i32_0 : i32, i32, i32, i32
  }
}

</mosaic_0001>

<bundles_post_ra>
// kernel: tpu_custom_call.1
= control target key start
LH: loop header
LB: loop body
LE: loop exit
PB: predicated region body
PF: predicated region fallthrough
CT: control target
= control target key end

     0   :  { %s4312_s0 = inlined_call_operand.vmem [shape: f32[2,16,16,8], index: 0, kind: input, shape index: {}]   ;;  %s4313_s1 = inlined_call_operand.vmem [shape: f32[8,128], index: 1, kind: input, shape index: {}]   ;;  %s4314_s2 = inlined_call_operand.vmem [shape: f32[1,128], index: 2, kind: input, shape index: {}]   ;;  %s4315_s3 = inlined_call_operand.vmem [shape: f32[9,128], index: 3, kind: input, shape index: {}]   ;;  %s4316_s4 = inlined_call_operand.vmem [shape: f32[1,128], index: 4, kind: input, shape index: {}]   ;;  %s4317_s5 = inlined_call_operand.vmem [shape: f32[128,128], index: 5, kind: input, shape index: {}]   ;;  %s4318_s6 = inlined_call_operand.vmem [shape: f32[1,128], index: 6, kind: input, shape index: {}]   ;;  %s4319_s7 = inlined_call_operand.vmem [shape: f32[8,128], index: 7, kind: input, shape index: {}]   ;;  %s4320_s8 = inlined_call_operand.hbm [shape: f32[2,16,16,128], index: 8, kind: output, shape index: {}]  }
   0x1   :  { %4324 = sst [smem:[#allocation8_spill]] %s4312_s0 }
   0x2   :  { %4325 = sst [smem:[#allocation9_spill]] %s4313_s1 }
   0x3   :  { %4326 = sst [smem:[#allocation10_spill]] %s4314_s2 }
   0x4   :  { %13 = vsyncpa [#allocation4], 0 }
   0x5   :  { %15 = vsyncpa [#allocation4 + $0x1], 0  ;;  %s3052_s27 = smov 0   ;;  %s3054_s28 = smov 0  }
   0x6   :  { %s3056_s29 = smov 0   ;;  %s3058_s30 = smov 0  }
   0x7   :  { %s3060_s9 = smov 0   ;;  %s3062_s10 = smov 0  }
   0x8   :  { %s3064_s11 = smov 0   ;;  %s3066_s12 = smov 0  }
   0x9 LB: > { %s2476_s13 = sadd.s32 4294967295, %s3001_s12   ;;  %s2477_s14 = sadd.s32 4294967294, %s3001_s12   ;;  %s3001_s12 = sphi %s3066_s12, %s21_s12   ;;  %s2997_s11 = sphi %s3064_s11, %s4343_s11   ;;  %s2993_s10 = sphi %s3062_s10, %s4342_s10   ;;  %s2989_s9 = sphi %s3060_s9, %s4341_s9   ;;  %s2985_s30 = sphi %s3058_s30, %s4340_s30   ;;  %s2981_s29 = sphi %s3056_s29, %s4339_s29   ;;  %s2977_s28 = sphi %s3054_s28, %s4338_s28   ;;  %s2973_s27 = sphi %s3052_s27, %s4337_s27  }
   0xa   : > { %s30_s15 = sadd.s32 1, %s2993_s10  ;;  %s33_s16 = sadd.s32 1, %s2997_s11 }
   0xb   : > { %p31_p0 = scmp.ge.s32.totalorder %s30_s15, 2  ;;  %p225_p1 = scmp.ne.s32.totalorder %s2981_s29, %s2977_s28 }
   0xc   : > { %p226_p2 = scmp.eq.s32.totalorder %s2476_s13, 3  ;;  %p231_p5 = scmp.ne.s32.totalorder %s2977_s28, %s2973_s27 }
   0xd   : > { %s4345_s15 = smov (%p31_p0, %s30_s15), 0  ;;  %s4347_s16 = smov (!%p31_p0, %s33_s16), %s2997_s11 }
   0xe   : > { %4327 = sst [smem:[#allocation6_spill]] %s4345_s15  ;;  %s211_s17 = ssub.s32 %s2993_s10, %s4345_s15 }
   0xf   : > { %p3103_p3 = por %p226_p2, %p225_p1  ;;  %p35_p4 = scmp.ge.s32.totalorder %s4347_s16, 2 }
  0x10   : > { %p232_p6 = scmp.eq.s32.totalorder %s2477_s14, 3  ;;  %p2480_p7 = scmp.ge.s32.totalorder %s3001_s12, 1 }
  0x11   : > { %s4349_s16 = smov (%p35_p4, %s4347_s16), 0  ;;  %p279_p9 = scmp.lt.s32.totalorder %s3001_s12, 5 }
  0x12   : > { %4329 = sst [smem:[#allocation7_spill]] %s4349_s16  ;;  %p3112_p8 = por %p232_p6, %p231_p5 }
  0x13   : > { %s210_s20 = ssub.s32 %s2997_s11, %s4349_s16  ;;  %s215_s21 = sadd.s32 1, %s2981_s29 }
  0x14   : > { %s212_s22 = sor.u32 %s211_s17, %s210_s20  ;;  %p280_p10 = pnand %p2480_p7, %p279_p9 }
  0x15   : > { %p213_p11 = scmp.eq.s32.totalorder %s212_s22, 0  ;;  %s4323_s24 = sand.u32 (!%p280_p10), 1, %s2977_s28  }
  0x16   : > { %283 = sbr.rel (%p280_p10) target bundleno = 722 (0x2d2), region = 52  ;;  %p313_p12 = scmp.lt.s32.totalorder (!%p280_p10), %s2989_s9, 1 }
  0x17   : > { %s3121_s23 = scalar_select %p213_p11, %s2981_s29, %s215_s21  }
  0x18   : > { %s2481_s25 = sshll.u32 (!%p280_p10), %s4323_s24, 7  ;;  %s4331_s0 = sld [smem:[#allocation8_spill]] (!%p280_p10) }
  0x19   : > { %s3133_s17 = scalar_lea.vmem (!%p280_p10), [#allocation3], %s2481_s25  ;;  %p2484_p13 = scmp.ne.s32.totalorder (!%p280_p10), %s2985_s30, 0 }
  0x1d   : > { %s314_s26 = scalar_select %p313_p12, %s2989_s9, 1 }
  0x1e   : > { %322 = sbr.rel (%p2484_p13) target bundleno = 287 (0x11f), region = 56  ;;  %s4332_s1 = sld [smem:[#allocation9_spill]] (!%p2484_p13)  ;;  %vm408_vm0 = vcmask (!%p2484_p13), 64512   ;;  %v3003_v3 = vmov (!%p2484_p13), 0.0  }
  0x1f   : > { %s2547_s13 = sshll.u32 %s314_s26, 8  ;;  %324 = vst [vmem:[#allocation2 + $0x8] sm:$0xff] (!%p2484_p13), %v3003_v3  ;;  %325 = vst [vmem:[#allocation2 + $0x10] sm:$0xff] (!%p2484_p13), %v3003_v3  ;;  %s4333_s2 = sld [smem:[#allocation10_spill]] (!%p2484_p13) }
  0x20   : > { %s3131_s16 = scalar_lea.vmem %s4331_s0, %s2547_s13  ;;  %326 = vst [vmem:[#allocation2 + $0x18] sm:$0x1] (!%p2484_p13), %v3003_v3  ;;  %329 = vst [vmem:[#allocation2 + $0x228] sm:$0xff] (!%p2484_p13), %v3003_v3 }
  0x21   : > { %v368_v1 = vld [vmem:[%s3131_s16] sm:$0xff] (!%p2484_p13)  ;;  %330 = vst [vmem:[#allocation2 + $0x230] sm:$0xff] (!%p2484_p13), %v3003_v3  ;;  %331 = vst [vmem:[#allocation2 + $0x238] sm:$0x1] (!%p2484_p13), %v3003_v3  ;;  %v369_v4 = vld [vmem:[%s3131_s16 + $0x8] sm:$0xff] (!%p2484_p13) }
  0x22   : > { %v384_v2 = vld [vmem:[%s3131_s16 + $0x80] sm:$0xff] (!%p2484_p13)  ;;  %332 = vst [vmem:[#allocation2] sm:$0xff] (!%p2484_p13), %v3003_v3  ;;  %333 = vst [vmem:[#allocation2 + $0x20] sm:$0xff] (!%p2484_p13), %v3003_v3  ;;  %v385_v5 = vld [vmem:[%s3131_s16 + $0x88] sm:$0xff] (!%p2484_p13)  ;;  %2635 = vmatprep.mubr.msk.f32.mxu0 (!%p2484_p13), %vm408_vm0, %v368_v1 }
  0x23   : > { %334 = vst [vmem:[#allocation2 + $0x40] sm:$0xff] (!%p2484_p13), %v3003_v3  ;;  %335 = vst [vmem:[#allocation2 + $0x60] sm:$0xff] (!%p2484_p13), %v3003_v3  ;;  %v370_v6 = vld [vmem:[%s3131_s16 + $0x10] sm:$0xff] (!%p2484_p13)  ;;  %2659 = vmatprep.mubr.msk.f32.mxu1 (!%p2484_p13), %vm408_vm0, %v384_v2  ;;  %v371_v8 = vld [vmem:[%s3131_s16 + $0x18] sm:$0xff] (!%p2484_p13) }
  0x24   : > { %v400_v0 = vld [vmem:[%s4332_s1] sm:$0xff] (!%p2484_p13)  ;;  %336 = vst [vmem:[#allocation2 + $0x80] sm:$0xff] (!%p2484_p13), %v3003_v3  ;;  %337 = vst [vmem:[#allocation2 + $0xa0] sm:$0xff] (!%p2484_p13), %v3003_v3  ;;  %v386_v7 = vld [vmem:[%s3131_s16 + $0x90] sm:$0xff] (!%p2484_p13) }
  0x25   : > { %338 = vst [vmem:[#allocation2 + $0xc0] sm:$0xff] %v3003_v3  ;;  %339 = vst [vmem:[#allocation2 + $0xe0] sm:$0xff] %v3003_v3  ;;  %2633 = vmatprep.subr.mxu0 %v400_v0  ;;  %2797 = vmatprep.subr.mxu1 %v400_v0  ;;  %v387_v9 = vld [vmem:[%s3131_s16 + $0x98] sm:$0xff]  ;;  %v372_v10 = vld [vmem:[%s3131_s16 + $0x20] sm:$0xff] }
  0x26   : > { %340 = vst [vmem:[#allocation2 + $0x100] sm:$0xff] %v3003_v3  ;;  %341 = vst [vmem:[#allocation2 + $0x120] sm:$0xff] %v3003_v3  ;;  %2634 = vmatpush3.msra.mxu0 %v400_v0  ;;  %2798 = vmatpush3.msra.mxu1 %v400_v0  ;;  %v388_v11 = vld [vmem:[%s3131_s16 + $0xa0] sm:$0xff]  ;;  %v373_v12 = vld [vmem:[%s3131_s16 + $0x28] sm:$0xff] }
  0x27   : > { %342 = vst [vmem:[#allocation2 + $0x140] sm:$0xff] %v3003_v3  ;;  %343 = vst [vmem:[#allocation2 + $0x160] sm:$0xff] %v3003_v3  ;;  %2636 = vmatmul.mubr.msk.f32.vlgmr.msra.gmra.mrb[0].mxu0 %vm408_vm0, %v369_v4  ;;  %2660 = vmatmul.mubr.msk.f32.vlgmr.msra.gmra.mrb[0].mxu1 %vm408_vm0, %v385_v5  ;;  %v389_v13 = vld [vmem:[%s3131_s16 + $0xa8] sm:$0xff]  ;;  %v374_v14 = vld [vmem:[%s3131_s16 + $0x30] sm:$0xff] }
  0x28   : > { %344 = vst [vmem:[#allocation2 + $0x180] sm:$0xff] %v3003_v3  ;;  %345 = vst [vmem:[#allocation2 + $0x1a0] sm:$0xff] %v3003_v3  ;;  %2638 = vmatprep.mubr.msk.f32.mxu0 %vm408_vm0, %v370_v6  ;;  %2662 = vmatprep.mubr.msk.f32.mxu1 %vm408_vm0, %v386_v7  ;;  %v390_v15 = vld [vmem:[%s3131_s16 + $0xb0] sm:$0xff]  ;;  %v375_v16 = vld [vmem:[%s3131_s16 + $0x38] sm:$0xff] }
  0x29   : > { %346 = vst [vmem:[#allocation2 + $0x1c0] sm:$0xff] %v3003_v3  ;;  %347 = vst [vmem:[#allocation2 + $0x1e0] sm:$0xff] %v3003_v3  ;;  %v391_v17 = vld [vmem:[%s3131_s16 + $0xb8] sm:$0xff]  ;;  %v376_v18 = vld [vmem:[%s3131_s16 + $0x40] sm:$0xff] }
  0x2a   : > { %348 = vst [vmem:[#allocation2 + $0x200] sm:$0xff] %v3003_v3  ;;  %349 = vst [vmem:[#allocation2 + $0x220] sm:$0xff] %v3003_v3  ;;  %v392_v19 = vld [vmem:[%s3131_s16 + $0xc0] sm:$0xff]  ;;  %v377_v20 = vld [vmem:[%s3131_s16 + $0x48] sm:$0xff] }
  0x2b   : > { %351 = vst [vmem:[#allocation2 + $0x38] sm:$0x1] %v3003_v3  ;;  %352 = vst [vmem:[#allocation2 + $0x58] sm:$0x1] %v3003_v3  ;;  %2639 = vmatmul.mubr.msk.f32.gmra.mrb[2].mxu0 %vm408_vm0, %v371_v8  ;;  %2663 = vmatmul.mubr.msk.f32.gmra.mrb[2].mxu1 %vm408_vm0, %v387_v9  ;;  %v393_v21 = vld [vmem:[%s3131_s16 + $0xc8] sm:$0xff]  ;;  %v378_v22 = vld [vmem:[%s3131_s16 + $0x50] sm:$0xff] }
  0x2c   : > { %353 = vst [vmem:[#allocation2 + $0x78] sm:$0x1] %v3003_v3  ;;  %354 = vst [vmem:[#allocation2 + $0x98] sm:$0x1] %v3003_v3  ;;  %2641 = vmatprep.mubr.msk.f32.mxu0 %vm408_vm0, %v372_v10  ;;  %2665 = vmatprep.mubr.msk.f32.mxu1 %vm408_vm0, %v388_v11  ;;  %v394_v23 = vld [vmem:[%s3131_s16 + $0xd0] sm:$0xff]  ;;  %v379_v24 = vld [vmem:[%s3131_s16 + $0x58] sm:$0xff] }
  0x2d   : > { %355 = vst [vmem:[#allocation2 + $0xb8] sm:$0x1] %v3003_v3  ;;  %356 = vst [vmem:[#allocation2 + $0xd8] sm:$0x1] %v3003_v3  ;;  %v395_v25 = vld [vmem:[%s3131_s16 + $0xd8] sm:$0xff]  ;;  %v380_v26 = vld [vmem:[%s3131_s16 + $0x60] sm:$0xff] }
  0x2e   : > { %357 = vst [vmem:[#allocation2 + $0xf8] sm:$0x1] %v3003_v3  ;;  %358 = vst [vmem:[#allocation2 + $0x118] sm:$0x1] %v3003_v3  ;;  %v396_v27 = vld [vmem:[%s3131_s16 + $0xe0] sm:$0xff]  ;;  %v381_v28 = vld [vmem:[%s3131_s16 + $0x68] sm:$0xff] }
  0x2f   : > { %359 = vst [vmem:[#allocation2 + $0x138] sm:$0x1] %v3003_v3  ;;  %360 = vst [vmem:[#allocation2 + $0x158] sm:$0x1] %v3003_v3  ;;  %2642 = vmatmul.mubr.msk.f32.gmra.mrb[4].mxu0 %vm408_vm0, %v373_v12  ;;  %2666 = vmatmul.mubr.msk.f32.gmra.mrb[4].mxu1 %vm408_vm0, %v389_v13  ;;  %v397_v29 = vld [vmem:[%s3131_s16 + $0xe8] sm:$0xff]  ;;  %v382_v30 = vld [vmem:[%s3131_s16 + $0x70] sm:$0xff] }
  0x30   : > { %361 = vst [vmem:[#allocation2 + $0x178] sm:$0x1] %v3003_v3  ;;  %362 = vst [vmem:[#allocation2 + $0x198] sm:$0x1] %v3003_v3  ;;  %2644 = vmatprep.mubr.msk.f32.mxu0 %vm408_vm0, %v374_v14  ;;  %2668 = vmatprep.mubr.msk.f32.mxu1 %vm408_vm0, %v390_v15  ;;  %v398_v31 = vld [vmem:[%s3131_s16 + $0xf0] sm:$0xff]  ;;  %v383_v32 = vld [vmem:[%s3131_s16 + $0x78] sm:$0xff] }
  0x31   : > { %363 = vst [vmem:[#allocation2 + $0x1b8] sm:$0x1] %v3003_v3  ;;  %364 = vst [vmem:[#allocation2 + $0x1d8] sm:$0x1] %v3003_v3  ;;  %v399_v33 = vld [vmem:[%s3131_s16 + $0xf8] sm:$0xff] }
  0x32   : > { %365 = vst [vmem:[#allocation2 + $0x1f8] sm:$0x1] %v3003_v3  ;;  %366 = vst [vmem:[#allocation2 + $0x218] sm:$0x1] %v3003_v3  ;;  %v3206_v34 = vld [vmem:[%s4333_s2] ss:$0 sm:$0xff] }
  0x33   : > { %350 = vst [vmem:[#allocation2 + $0x18] sm:$0x1] %v3003_v3  ;;  %367 = vst [vmem:[#allocation2 + $0x238] sm:$0x1] %v3003_v3  ;;  %2645 = vmatmul.mubr.msk.f32.gmra.mrb[6].mxu0 %vm408_vm0, %v375_v16  ;;  %2669 = vmatmul.mubr.msk.f32.gmra.mrb[6].mxu1 %vm408_vm0, %v391_v17 }
  0x34   : > { %2647 = vmatprep.mubr.msk.f32.mxu0 %vm408_vm0, %v376_v18  ;;  %2671 = vmatprep.mubr.msk.f32.mxu1 %vm408_vm0, %v392_v19 }
  0x37   : > { %2648 = vmatmul.mubr.msk.f32.gmra.mrb[8].mxu0 %vm408_vm0, %v377_v20  ;;  %2672 = vmatmul.mubr.msk.f32.gmra.mrb[8].mxu1 %vm408_vm0, %v393_v21 }
  0x38   : > { %2650 = vmatprep.mubr.msk.f32.mxu0 %vm408_vm0, %v378_v22  ;;  %2674 = vmatprep.mubr.msk.f32.mxu1 %vm408_vm0, %v394_v23 }
  0x3b   : > { %2651 = vmatmul.mubr.msk.f32.gmra.mrb[10].mxu0 %vm408_vm0, %v379_v24  ;;  %2675 = vmatmul.mubr.msk.f32.gmra.mrb[10].mxu1 %vm408_vm0, %v395_v25 }
  0x3c   : > { %2653 = vmatprep.mubr.msk.f32.mxu0 %vm408_vm0, %v380_v26  ;;  %2677 = vmatprep.mubr.msk.f32.mxu1 %vm408_vm0, %v396_v27 }
  0x3f   : > { %2654 = vmatmul.mubr.msk.f32.gmra.mrb[12].mxu0 %vm408_vm0, %v381_v28  ;;  %2678 = vmatmul.mubr.msk.f32.gmra.mrb[12].mxu1 %vm408_vm0, %v397_v29 }
  0x40   : > { %2656 = vmatprep.mubr.msk.f32.mxu0 %vm408_vm0, %v382_v30  ;;  %2680 = vmatprep.mubr.msk.f32.mxu1 %vm408_vm0, %v398_v31 }
  0x43   : > { %2657 = vmatmul.mubr.msk.f32.gmra.mrb[14].mxu0 %vm408_vm0, %v383_v32  ;;  %2681 = vmatmul.mubr.msk.f32.gmra.mrb[14].mxu1 %vm408_vm0, %v399_v33 }
  0xfa   : > { %v2637_v35 = vpop.f32.mrb[0].mxu0  ;;  %v2661_v36 = vpop.f32.mrb[0].mxu1 }
  0xfb   : > { %v577_v37 = vadd.f32 %v2637_v35, %v3206_v34  ;;  %v657_v38 = vadd.f32 %v2661_v36, %v3206_v34  ;;  %v571_v39 = vpop.f32.mrb[1].mxu0  ;;  %v651_v40 = vpop.f32.mrb[1].mxu1 }
  0xfc   : > { %v572_v41 = vadd.f32 %v3206_v34, %v571_v39  ;;  %v652_v42 = vadd.f32 %v3206_v34, %v651_v40 }
  0xfd   : > { %v731_v43 = vmax.f32 %v577_v37, 0.0  ;;  %v747_v44 = vmax.f32 %v657_v38, 0.0 }
  0xfe   : > { %v730_v45 = vmax.f32 %v572_v41, 0.0  ;;  %v746_v46 = vmax.f32 %v652_v42, 0.0  ;;  %v2640_v47 = vpop.f32.mrb[2].mxu0  ;;  %v2664_v48 = vpop.f32.mrb[2].mxu1 }
  0xff   : > { %v763_v49 = vmin.f32 %v731_v43, 6.0  ;;  %v779_v50 = vmin.f32 %v747_v44, 6.0  ;;  %v587_v51 = vadd.f32 %v2640_v47, %v3206_v34  ;;  %v667_v52 = vadd.f32 %v2664_v48, %v3206_v34  ;;  %v581_v53 = vpop.f32.mrb[3].mxu0  ;;  %v661_v54 = vpop.f32.mrb[3].mxu1 }
 0x100   : > { %v762_v55 = vmin.f32 %v730_v45, 6.0  ;;  %v778_v56 = vmin.f32 %v746_v46, 6.0  ;;  %v582_v57 = vadd.f32 %v3206_v34, %v581_v53  ;;  %v662_v58 = vadd.f32 %v3206_v34, %v661_v54 }
 0x101   : > { %796 = vst [vmem:[#allocation2 + $0x30] sm:$0xff] %v763_v49  ;;  %812 = vst [vmem:[#allocation2 + $0x130] sm:$0xff] %v779_v50  ;;  %v733_v59 = vmax.f32 %v587_v51, 0.0  ;;  %v749_v60 = vmax.f32 %v667_v52, 0.0 }
 0x102   : > { %795 = vst [vmem:[#allocation2 + $0x28] sm:$0xff] %v762_v55  ;;  %811 = vst [vmem:[#allocation2 + $0x128] sm:$0xff] %v778_v56  ;;  %v732_v61 = vmax.f32 %v582_v57, 0.0  ;;  %v748_v62 = vmax.f32 %v662_v58, 0.0  ;;  %v2643_v63 = vpop.f32.mrb[4].mxu0  ;;  %v2667_v0 = vpop.f32.mrb[4].mxu1 }
 0x103   : > { %v765_v1 = vmin.f32 %v733_v59, 6.0  ;;  %v781_v2 = vmin.f32 %v749_v60, 6.0  ;;  %v597_v3 = vadd.f32 %v2643_v63, %v3206_v34  ;;  %v677_v4 = vadd.f32 %v2667_v0, %v3206_v34  ;;  %v591_v5 = vpop.f32.mrb[5].mxu0  ;;  %v671_v6 = vpop.f32.mrb[5].mxu1 }
 0x104   : > { %v764_v7 = vmin.f32 %v732_v61, 6.0  ;;  %v780_v8 = vmin.f32 %v748_v62, 6.0  ;;  %v592_v9 = vadd.f32 %v3206_v34, %v591_v5  ;;  %v672_v10 = vadd.f32 %v3206_v34, %v671_v6 }
 0x105   : > { %798 = vst [vmem:[#allocation2 + $0x50] sm:$0xff] %v765_v1  ;;  %814 = vst [vmem:[#allocation2 + $0x150] sm:$0xff] %v781_v2  ;;  %v735_v11 = vmax.f32 %v597_v3, 0.0  ;;  %v751_v12 = vmax.f32 %v677_v4, 0.0 }
 0x106   : > { %797 = vst [vmem:[#allocation2 + $0x48] sm:$0xff] %v764_v7  ;;  %813 = vst [vmem:[#allocation2 + $0x148] sm:$0xff] %v780_v8  ;;  %v734_v13 = vmax.f32 %v592_v9, 0.0  ;;  %v750_v14 = vmax.f32 %v672_v10, 0.0  ;;  %v2646_v15 = vpop.f32.mrb[6].mxu0  ;;  %v2670_v16 = vpop.f32.mrb[6].mxu1 }
 0x107   : > { %v767_v17 = vmin.f32 %v735_v11, 6.0  ;;  %v783_v18 = vmin.f32 %v751_v12, 6.0  ;;  %v607_v19 = vadd.f32 %v2646_v15, %v3206_v34  ;;  %v687_v20 = vadd.f32 %v2670_v16, %v3206_v34  ;;  %v601_v21 = vpop.f32.mrb[7].mxu0  ;;  %v681_v22 = vpop.f32.mrb[7].mxu1 }
 0x108   : > { %v766_v23 = vmin.f32 %v734_v13, 6.0  ;;  %v782_v24 = vmin.f32 %v750_v14, 6.0  ;;  %v602_v25 = vadd.f32 %v3206_v34, %v601_v21  ;;  %v682_v26 = vadd.f32 %v3206_v34, %v681_v22 }
 0x109   : > { %800 = vst [vmem:[#allocation2 + $0x70] sm:$0xff] %v767_v17  ;;  %816 = vst [vmem:[#allocation2 + $0x170] sm:$0xff] %v783_v18  ;;  %v737_v27 = vmax.f32 %v607_v19, 0.0  ;;  %v753_v28 = vmax.f32 %v687_v20, 0.0 }
 0x10a   : > { %799 = vst [vmem:[#allocation2 + $0x68] sm:$0xff] %v766_v23  ;;  %815 = vst [vmem:[#allocation2 + $0x168] sm:$0xff] %v782_v24  ;;  %v736_v29 = vmax.f32 %v602_v25, 0.0  ;;  %v752_v30 = vmax.f32 %v682_v26, 0.0  ;;  %v2649_v31 = vpop.f32.mrb[8].mxu0  ;;  %v2673_v32 = vpop.f32.mrb[8].mxu1 }
 0x10b   : > { %v769_v33 = vmin.f32 %v737_v27, 6.0  ;;  %v785_v35 = vmin.f32 %v753_v28, 6.0  ;;  %v617_v36 = vadd.f32 %v2649_v31, %v3206_v34  ;;  %v697_v37 = vadd.f32 %v2673_v32, %v3206_v34  ;;  %v611_v38 = vpop.f32.mrb[9].mxu0  ;;  %v691_v39 = vpop.f32.mrb[9].mxu1 }
 0x10c   : > { %v768_v40 = vmin.f32 %v736_v29, 6.0  ;;  %v784_v41 = vmin.f32 %v752_v30, 6.0  ;;  %v612_v42 = vadd.f32 %v3206_v34, %v611_v38  ;;  %v692_v43 = vadd.f32 %v3206_v34, %v691_v39 }
 0x10d   : > { %802 = vst [vmem:[#allocation2 + $0x90] sm:$0xff] %v769_v33  ;;  %818 = vst [vmem:[#allocation2 + $0x190] sm:$0xff] %v785_v35  ;;  %v739_v44 = vmax.f32 %v617_v36, 0.0  ;;  %v755_v45 = vmax.f32 %v697_v37, 0.0 }
 0x10e   : > { %801 = vst [vmem:[#allocation2 + $0x88] sm:$0xff] %v768_v40  ;;  %817 = vst [vmem:[#allocation2 + $0x188] sm:$0xff] %v784_v41  ;;  %v738_v46 = vmax.f32 %v612_v42, 0.0  ;;  %v754_v47 = vmax.f32 %v692_v43, 0.0  ;;  %v2652_v48 = vpop.f32.mrb[10].mxu0  ;;  %v2676_v49 = vpop.f32.mrb[10].mxu1 }
 0x10f   : > { %v771_v50 = vmin.f32 %v739_v44, 6.0  ;;  %v787_v51 = vmin.f32 %v755_v45, 6.0  ;;  %v627_v52 = vadd.f32 %v2652_v48, %v3206_v34  ;;  %v707_v53 = vadd.f32 %v2676_v49, %v3206_v34  ;;  %v621_v54 = vpop.f32.mrb[11].mxu0  ;;  %v701_v55 = vpop.f32.mrb[11].mxu1 }
 0x110   : > { %v770_v56 = vmin.f32 %v738_v46, 6.0  ;;  %v786_v57 = vmin.f32 %v754_v47, 6.0  ;;  %v622_v58 = vadd.f32 %v3206_v34, %v621_v54  ;;  %v702_v59 = vadd.f32 %v3206_v34, %v701_v55 }
 0x111   : > { %804 = vst [vmem:[#allocation2 + $0xb0] sm:$0xff] %v771_v50  ;;  %820 = vst [vmem:[#allocation2 + $0x1b0] sm:$0xff] %v787_v51  ;;  %v741_v60 = vmax.f32 %v627_v52, 0.0  ;;  %v757_v61 = vmax.f32 %v707_v53, 0.0 }
 0x112   : > { %803 = vst [vmem:[#allocation2 + $0xa8] sm:$0xff] %v770_v56  ;;  %819 = vst [vmem:[#allocation2 + $0x1a8] sm:$0xff] %v786_v57  ;;  %v740_v62 = vmax.f32 %v622_v58, 0.0  ;;  %v756_v63 = vmax.f32 %v702_v59, 0.0  ;;  %v2655_v0 = vpop.f32.mrb[12].mxu0  ;;  %v2679_v1 = vpop.f32.mrb[12].mxu1 }
 0x113   : > { %v773_v2 = vmin.f32 %v741_v60, 6.0  ;;  %v789_v3 = vmin.f32 %v757_v61, 6.0  ;;  %v637_v4 = vadd.f32 %v2655_v0, %v3206_v34  ;;  %v717_v5 = vadd.f32 %v2679_v1, %v3206_v34  ;;  %v631_v6 = vpop.f32.mrb[13].mxu0  ;;  %v711_v7 = vpop.f32.mrb[13].mxu1 }
 0x114   : > { %v772_v8 = vmin.f32 %v740_v62, 6.0  ;;  %v788_v9 = vmin.f32 %v756_v63, 6.0  ;;  %v632_v10 = vadd.f32 %v3206_v34, %v631_v6  ;;  %v712_v11 = vadd.f32 %v3206_v34, %v711_v7 }
 0x115   : > { %806 = vst [vmem:[#allocation2 + $0xd0] sm:$0xff] %v773_v2  ;;  %822 = vst [vmem:[#allocation2 + $0x1d0] sm:$0xff] %v789_v3  ;;  %v743_v12 = vmax.f32 %v637_v4, 0.0  ;;  %v759_v13 = vmax.f32 %v717_v5, 0.0 }
 0x116   : > { %805 = vst [vmem:[#allocation2 + $0xc8] sm:$0xff] %v772_v8  ;;  %821 = vst [vmem:[#allocation2 + $0x1c8] sm:$0xff] %v788_v9  ;;  %v742_v14 = vmax.f32 %v632_v10, 0.0  ;;  %v758_v15 = vmax.f32 %v712_v11, 0.0  ;;  %v2658_v16 = vpop.f32.mrb[14].mxu0  ;;  %v2682_v17 = vpop.f32.mrb[14].mxu1 }
 0x117   : > { %v775_v18 = vmin.f32 %v743_v12, 6.0  ;;  %v791_v19 = vmin.f32 %v759_v13, 6.0  ;;  %v647_v20 = vadd.f32 %v2658_v16, %v3206_v34  ;;  %v727_v21 = vadd.f32 %v2682_v17, %v3206_v34  ;;  %v641_v22 = vpop.f32.mrb[15].mxu0  ;;  %v721_v23 = vpop.f32.mrb[15].mxu1 }
 0x118   : > { %v774_v24 = vmin.f32 %v742_v14, 6.0  ;;  %v790_v25 = vmin.f32 %v758_v15, 6.0  ;;  %v642_v26 = vadd.f32 %v3206_v34, %v641_v22  ;;  %v722_v27 = vadd.f32 %v3206_v34, %v721_v23 }
 0x119   : > { %808 = vst [vmem:[#allocation2 + $0xf0] sm:$0xff] %v775_v18  ;;  %824 = vst [vmem:[#allocation2 + $0x1f0] sm:$0xff] %v791_v19  ;;  %v745_v28 = vmax.f32 %v647_v20, 0.0  ;;  %v761_v29 = vmax.f32 %v727_v21, 0.0 }
 0x11a   : > { %807 = vst [vmem:[#allocation2 + $0xe8] sm:$0xff] %v774_v24  ;;  %823 = vst [vmem:[#allocation2 + $0x1e8] sm:$0xff] %v790_v25  ;;  %v744_v30 = vmax.f32 %v642_v26, 0.0  ;;  %v760_v31 = vmax.f32 %v722_v27, 0.0 }
 0x11b   : > { %v777_v32 = vmin.f32 %v745_v28, 6.0  ;;  %v793_v33 = vmin.f32 %v761_v29, 6.0 }
 0x11c   : > { %v776_v35 = vmin.f32 %v744_v30, 6.0  ;;  %v792_v36 = vmin.f32 %v760_v31, 6.0 }
 0x11d   : > { %810 = vst [vmem:[#allocation2 + $0x110] sm:$0xff] %v777_v32  ;;  %826 = vst [vmem:[#allocation2 + $0x210] sm:$0xff] %v793_v33 }
 0x11e   : > { %809 = vst [vmem:[#allocation2 + $0x108] sm:$0xff] %v776_v35  ;;  %825 = vst [vmem:[#allocation2 + $0x208] sm:$0xff] %v792_v36 }
 0x11f PF: > { %v1934_v34 = vld [vmem:[%s4317_s5] sm:$0xff]  ;;  %v1935_v37 = vld [vmem:[%s4317_s5 + $0x8] sm:$0xff]  ;;  %v1936_v38 = vld [vmem:[%s4317_s5 + $0x10] sm:$0xff]  ;;  %v872_v39 = vlaneseq  ;;  %s2548_s13 = sshll.u32 %s2985_s30, 8  ;;  %s2549_s21 = sshll.u32 %s2985_s30, 7  ;;  %vm960_vm1 = vcmask 1046528  }
 0x120   : > { %v2765_v40 = vpack.c.bf16 %v1935_v37, %v1934_v34  ;;  %v1937_v41 = vld [vmem:[%s4317_s5 + $0x18] sm:$0xff]  ;;  %v1938_v42 = vld [vmem:[%s4317_s5 + $0x20] sm:$0xff]  ;;  %v1939_v43 = vld [vmem:[%s4317_s5 + $0x28] sm:$0xff]  ;;  %s3290_s26 = scalar_lea.vmem [#allocation2], %s2548_s13  ;;  %vm1085_vm2 = vcmask 1045504   ;;  %vm2121_vm3 = vcmask 64512   ;;  %s3305_s20 = scalar_lea.vmem %s3131_s16, %s2549_s21 }
 0x121   : > { %v2769_v44 = vpack.c.bf16 %v1937_v41, %v1936_v38  ;;  %v873_v45 = vshrl.u32 %v872_v39, 7  ;;  %v1940_v46 = vld [vmem:[%s4317_s5 + $0x30] sm:$0xff]  ;;  %v1941_v47 = vld [vmem:[%s4317_s5 + $0x38] sm:$0xff]  ;;  %v1942_v48 = vld [vmem:[%s4317_s5 + $0x40] sm:$0xff]  ;;  %v2773_v49 = vpack.c.bf16 %v1939_v43, %v1938_v42  ;;  %vm1877_vm4 = vcmask 1040384   ;;  %s2543_s15 = sshll.u32 %s2989_s9, 5 }
 0x122   : > { %2766 = vmatprep.subr.bf16.mxu1 %v2765_v40  ;;  %v1943_v50 = vld [vmem:[%s4317_s5 + $0x48] sm:$0xff]  ;;  %v1944_v51 = vld [vmem:[%s4317_s5 + $0x50] sm:$0xff]  ;;  %v1945_v52 = vld [vmem:[%s4317_s5 + $0x58] sm:$0xff]  ;;  %v2777_v2 = vpack.c.bf16 %v1941_v47, %v1940_v46  ;;  %s2396_s21 = sshll.u32 %s3133_s17, 4  ;;  %s4334_s0 = sand.u32 1, %s2977_s28   ;;  %s4254_s21 = int_to_ptr.vmem [resolvable:$true] %s2396_s21 }
 0x123   : > { %2768 = vmatpush3.bf16.msra.mxu1 %v2765_v40  ;;  %v1946_v53 = vld [vmem:[%s4317_s5 + $0x60] sm:$0xff]  ;;  %v1947_v54 = vld [vmem:[%s4317_s5 + $0x68] sm:$0xff]  ;;  %v874_v55 = vsub.s32 0, %v873_v45  ;;  %v926_v56 = vsub.s32 1, %v873_v45  ;;  %v1035_v57 = vsub.s32 2, %v873_v45  ;;  %v1176_v58 = vsub.s32 3, %v873_v45 }
 0x124   : > { %2770 = vmatprep.subr.bf16.mxu1 %v2769_v44  ;;  %v1228_v59 = vsub.s32 4, %v873_v45  ;;  %v1336_v60 = vsub.s32 5, %v873_v45  ;;  %v1476_v61 = vsub.s32 6, %v873_v45  ;;  %v1948_v62 = vld [vmem:[%s4317_s5 + $0x70] sm:$0xff]  ;;  %v1949_v63 = vld [vmem:[%s4317_s5 + $0x78] sm:$0xff]  ;;  %v1528_v1 = vsub.s32 7, %v873_v45 }
 0x125   : > { %v830_v0 = vld [vmem:[%s3290_s26] sm:$0xff]  ;;  %v3293_v3 = vpack.c.bf16 %v1943_v50, %v1942_v48  ;;  %v3295_v4 = vpack.c.bf16 %v1945_v52, %v1944_v51  ;;  %v3297_v5 = vpack.c.bf16 %v1947_v54, %v1946_v53  ;;  %v831_v6 = vld [vmem:[%s3290_s26 + $0x8] sm:$0xff]  ;;  %v3308_v9 = vld [vmem:[%s3290_s26 + $0x10] sm:$0xff]  ;;  %v3324_v16 = vpack.c.bf16 %v1949_v63, %v1948_v62  ;;  %s4260_s24 = scalar_lea.sflag [#allocation4], %s4334_s0  ;;  %s2907_s25 = scalar_lea.vmem %s4254_s21, 2048 }
 0x126   : > { %v834_v7 = vld [vmem:[%s3290_s26 + $0x20] sm:$0xff]  ;;  %v3311_v10 = vld [vmem:[%s3290_s26 + $0x48] sm:$0xff]  ;;  %v3366_v34 = vld [vmem:[%s3290_s26 + $0x30] sm:$0xff]  ;;  %p2908_p0 = scmp.ne.s32.totalorder %s4254_s21, %s2907_s25  ;;  %s3004_s2 = smov [#allocation3]  }
 0x127   : > { %2772 = vmatpush3.bf16.msra.mxu1 %v2769_v44  ;;  %v870_v8 = vld [vmem:[%s4315_s3] sm:$0xff]  ;;  %v3342_v26 = vld [vmem:[%s3290_s26 + $0x28] sm:$0xff]  ;;  %v2106_v41 = vld [vmem:[%s3305_s20 + $0x10] sm:$0xff]  ;;  %s2911_s13 = sshll.u32 %s3004_s2, 4  ;;  %s2912_s13 = int_to_ptr.vmem [resolvable:$false] %s2911_s13 }
 0x128   : > { %2774 = vmatprep.subr.bf16.mxu1 %v2773_v49  ;;  %v3313_v11 = vrot.slane %v870_v8, %v874_v55  ;;  %v3315_v12 = vrot.slane %v870_v8, %v926_v56  ;;  %v3317_v13 = vrot.slane %v870_v8, %v1035_v57  ;;  %v3319_v14 = vrot.slane %v870_v8, %v1176_v58  ;;  %v2120_v15 = vld [vmem:[%s4319_s7] sm:$0xff]  ;;  %v2105_v31 = vld [vmem:[%s3305_s20 + $0x8] sm:$0xff]  ;;  %v2107_v50 = vld [vmem:[%s3305_s20 + $0x18] sm:$0xff]  ;;  %p2909_p1 = pnand %p2908_p0, %p3103_p3  ;;  %p2914_p4 = scmp.lt.s32.totalorder %s4254_s21, %s2912_s13 }
 0x129   : > { %v838_v17 = vld [vmem:[%s3290_s26 + $0x40] sm:$0xff]  ;;  %v3327_v18 = vrot.slane %v870_v8, %v1228_v59  ;;  %v3329_v19 = vrot.slane %v870_v8, %v1336_v60  ;;  %v3331_v20 = vrot.slane %v870_v8, %v1476_v61  ;;  %2739 = vmatprep.subr.mxu0 %v2120_v15  ;;  %v3338_v24 = vrot.slane %v870_v8, %v1528_v1  ;;  %v3395_v51 = vld [vmem:[%s4315_s3 + $0x8] ss:$0 sm:$0xff]  ;;  %v3406_v61 = vld [vmem:[%s3290_s26 + $0x50] sm:$0xff] }
 0x12a   : > { %v876_v21 = vmul.f32 %v3313_v11, %v830_v0  ;;  %v877_v22 = vmul.f32 %v3313_v11, %v831_v6  ;;  %v3336_v23 = vmul.f32 %v3313_v11, %v834_v7  ;;  %2740 = vmatpush3.msra.mxu0 %v2120_v15  ;;  %v2104_v25 = vld [vmem:[%s3305_s20] sm:$0xff]  ;;  %v928_v27 = vmul.f32 %v3315_v12, %v831_v6  ;;  %p2910_p2 = pneg %p2909_p1 }
 0x12b   : > { %2776 = vmatpush3.bf16.msra.mxu1 %v2773_v49  ;;  %v3347_v28 = vmul.f32 %v3315_v12, %v3308_v9  ;;  %v3351_v29 = vmul.f32 %v3315_v12, %v3311_v10  ;;  %v1037_v30 = vmul.f32 %v3317_v13, %v831_v6  ;;  %v3356_v32 = vmul.f32 %v3313_v11, %v838_v17  ;;  %v2108_v60 = vld [vmem:[%s3305_s20 + $0x20] sm:$0xff] }
 0x12c   : > { %2778 = vmatprep.subr.bf16.mxu1 %v2777_v2  ;;  %v3360_v33 = vmul.f32 %v3317_v13, %v3308_v9  ;;  %v1178_v35 = vmul.f32 %v3319_v14, %v834_v7  ;;  %v1179_v36 = vmul.f32 %v3319_v14, %v3342_v26  ;;  %v961_v37 = vrot.slane %v928_v27, 1  ;;  %2741 = vmatprep.mubr.msk.f32.mxu0 %vm2121_vm3, %v2104_v25  ;;  %v841_v27 = vld [vmem:[%s3290_s26 + $0x58] sm:$0x1] }
 0x12d   : > { %v962_v38 = vrot.slane %v3347_v28, 1  ;;  %v1086_v39 = vrot.slane %v1037_v30, 2  ;;  %v3370_v40 = vmul.f32 %v3319_v14, %v838_v17  ;;  %v1230_v43 = vmul.f32 %v3327_v18, %v3342_v26  ;;  %2742 = vmatmul.mubr.msk.f32.vlgmr.msra.gmra.mrb[0].mxu0 %vm2121_vm3, %v2105_v31  ;;  %v2110_v30 = vld [vmem:[%s3305_s20 + $0x30] sm:$0xff] }
 0x12e   : > { %v1087_v42 = vrot.slane %v3360_v33, 2  ;;  %v3379_v44 = vmul.f32 %v3327_v18, %v3366_v34  ;;  %v1338_v45 = vmul.f32 %v3329_v19, %v3342_v26  ;;  %v967_v47 = vrot.slane %v3351_v29, 1  ;;  %2744 = vmatprep.mubr.msk.f32.mxu0 %vm2121_vm3, %v2106_v41 }
 0x12f   : > { %2780 = vmatpush3.bf16.msra.mxu1 %v2777_v2  ;;  %v963_v46 = vsel %vm960_vm1, %v961_v37, %v962_v38  ;;  %v1009_v48 = vadd.f32 %v961_v37, %v876_v21  ;;  %v3388_v49 = vmul.f32 %v3329_v19, %v3366_v34  ;;  %v1262_v54 = vrot.slane %v1230_v43, 1  ;;  %v833_v2 = vld [vmem:[%s3290_s26 + $0x18] sm:$0x1]  ;;  %v2109_v21 = vld [vmem:[%s3305_s20 + $0x28] sm:$0xff] }
 0x130   : > { %2782 = vmatprep.subr.bf16.mxu1 %v3293_v3  ;;  %v1010_v52 = vadd.f32 %v963_v46, %v877_v22  ;;  %v1088_v53 = vsel %vm1085_vm2, %v1086_v39, %v1087_v42  ;;  %v1263_v55 = vrot.slane %v3379_v44, 1  ;;  %v1386_v57 = vrot.slane %v1338_v45, 2 }
 0x131   : > { %v1150_v56 = vadd.f32 %v1086_v39, %v1009_v48  ;;  %v1387_v58 = vrot.slane %v3388_v49, 2  ;;  %v1478_v59 = vmul.f32 %v3331_v20, %v838_v17  ;;  %v1479_v0 = vmul.f32 %v3331_v20, %v3311_v10  ;;  %2745 = vmatmul.mubr.msk.f32.gmra.mrb[2].mxu0 %vm2121_vm3, %v2107_v50  ;;  %v837_v17 = vld [vmem:[%s3290_s26 + $0x38] sm:$0x1] }
 0x132   : > { %v1151_v62 = vadd.f32 %v1088_v53, %v1010_v52  ;;  %v1264_v63 = vsel %vm960_vm1, %v1262_v54, %v1263_v55  ;;  %v1530_v1 = vmul.f32 %v3338_v24, %v3311_v10  ;;  %v3423_v8 = vmul.f32 %v3338_v24, %v3406_v61  ;;  %2747 = vmatprep.mubr.msk.f32.mxu0 %vm2121_vm3, %v2108_v60 }
 0x133   : > { %2784 = vmatpush3.bf16.msra.mxu1 %v3293_v3  ;;  %v1202_v6 = vadd.f32 %v1178_v35, %v1150_v56  ;;  %v1388_v7 = vsel %vm1085_vm2, %v1386_v57, %v1387_v58  ;;  %v1638_v15 = vmul.f32 %v3395_v51, %v3311_v10  ;;  %v3432_v3 = vmul.f32 %v3395_v51, %v3406_v61 }
 0x134   : > { %2786 = vmatprep.subr.bf16.mxu1 %v3295_v4  ;;  %v1203_v22 = vadd.f32 %v1179_v36, %v1151_v62  ;;  %v1562_v25 = vrot.slane %v1530_v1, 1  ;;  %v878_v28 = vmul.f32 %v3313_v11, %v3308_v9  ;;  %v1563_v35 = vrot.slane %v3423_v8, 1 }
 0x135   : > { %v1310_v31 = vadd.f32 %v1262_v54, %v1202_v6  ;;  %v1686_v37 = vrot.slane %v1638_v15, 2  ;;  %v1039_v39 = vmul.f32 %v3317_v13, %v833_v2  ;;  %v1687_v41 = vrot.slane %v3432_v3, 2  ;;  %2748 = vmatmul.mubr.msk.f32.gmra.mrb[4].mxu0 %vm2121_vm3, %v2109_v21  ;;  %v2112_v54 = vld [vmem:[%s3305_s20 + $0x40] sm:$0xff]  ;;  %v2113_v15 = vld [vmem:[%s3305_s20 + $0x48] sm:$0xff] }
 0x136   : > { %v1311_v36 = vadd.f32 %v1264_v63, %v1203_v22  ;;  %v1011_v43 = vadd.f32 %v962_v38, %v878_v28  ;;  %v3443_v45 = vmul.f32 %v3317_v13, %v837_v17  ;;  %v3450_v9 = vadd.f32 %v967_v47, %v3356_v32  ;;  %2750 = vmatprep.mubr.msk.f32.mxu0 %vm2121_vm3, %v2110_v30  ;;  %v2111_v38 = vld [vmem:[%s3305_s20 + $0x38] sm:$0xff] }
 0x137   : > { %2788 = vmatpush3.bf16.msra.mxu1 %v3295_v4  ;;  %v1450_v46 = vadd.f32 %v1386_v57, %v1310_v31  ;;  %v3453_v48 = vmul.f32 %v3317_v13, %v841_v27  ;;  %v1089_v50 = vrot.slane %v1039_v39, 2  ;;  %v1564_v4 = vsel %vm960_vm1, %v1562_v25, %v1563_v35 }
 0x138   : > { %2790 = vmatprep.subr.bf16.mxu1 %v3297_v5  ;;  %v1451_v52 = vadd.f32 %v1388_v7, %v1311_v36  ;;  %v1688_v32 = vsel %vm1085_vm2, %v1686_v37, %v1687_v41  ;;  %v1180_v53 = vmul.f32 %v3319_v14, %v3366_v34  ;;  %v1094_v60 = vrot.slane %v3443_v45, 2  ;;  %v2114_v36 = vld [vmem:[%s3305_s20 + $0x50] sm:$0xff] }
 0x139   : > { %v1502_v56 = vadd.f32 %v1478_v59, %v1450_v46  ;;  %v1090_v57 = vsel %vm1085_vm2, %v1087_v42, %v1089_v50  ;;  %v1340_v62 = vmul.f32 %v3329_v19, %v837_v17  ;;  %v1099_v1 = vrot.slane %v3453_v48, 2  ;;  %2751 = vmatmul.mubr.msk.f32.gmra.mrb[6].mxu0 %vm2121_vm3, %v2111_v38 }
 0x13a   : > { %v1503_v63 = vadd.f32 %v1479_v0, %v1451_v52  ;;  %v1152_v2 = vadd.f32 %v1090_v57, %v1011_v43  ;;  %v3474_v6 = vmul.f32 %v3329_v19, %v841_v27  ;;  %v1480_v42 = vmul.f32 %v3331_v20, %v3406_v61  ;;  %v3482_v0 = vld [vmem:[%s3290_s26 + $0x68] sm:$0xff]  ;;  %2753 = vmatprep.mubr.msk.f32.mxu0 %vm2121_vm3, %v2112_v54 }
 0x13b   : > { %2792 = vmatpush3.bf16.msra.mxu1 %v3297_v5  ;;  %v1610_v33 = vadd.f32 %v1562_v25, %v1502_v56  ;;  %v1389_v59 = vrot.slane %v1340_v62, 2  ;;  %v1640_v7 = vmul.f32 %v3395_v51, %v841_v27  ;;  %v3490_v5 = vld [vmem:[%s4316_s4] ss:$0 sm:$0xff]  ;;  %v880_v27 = vmul.f32 %v3313_v11, %v3342_v26 }
 0x13c   : > { %2794 = vmatprep.subr.bf16.mxu1 %v3324_v16  ;;  %v1611_v17 = vadd.f32 %v1564_v4, %v1503_v63  ;;  %v1204_v21 = vadd.f32 %v1180_v53, %v1152_v2  ;;  %v1394_v22 = vrot.slane %v3474_v6, 2  ;;  %v3494_v25 = vld [vmem:[%s3290_s26 + $0x60] sm:$0xff]  ;;  %v930_v39 = vmul.f32 %v3315_v12, %v3342_v26 }
 0x13d   : > { %v1750_v28 = vadd.f32 %v1686_v37, %v1610_v33  ;;  %v1390_v30 = vsel %vm1085_vm2, %v1387_v58, %v1389_v59  ;;  %v1689_v31 = vrot.slane %v1640_v7, 2  ;;  %v3508_v50 = vmul.f32 %v3315_v12, %v3366_v34  ;;  %2754 = vmatmul.mubr.msk.f32.gmra.mrb[8].mxu0 %vm2121_vm3, %v2113_v15 }
 0x13e   : > { %v1751_v43 = vadd.f32 %v1688_v32, %v1611_v17  ;;  %v1312_v46 = vadd.f32 %v1263_v55, %v1204_v21  ;;  %v3512_v37 = vmul.f32 %v3315_v12, %v3482_v0  ;;  %v885_v58 = vmul.f32 %v3313_v11, %v3494_v25  ;;  %2756 = vmatprep.mubr.msk.f32.mxu0 %vm2121_vm3, %v2114_v36  ;;  %v2115_v55 = vld [vmem:[%s3305_s20 + $0x58] sm:$0xff] }
 0x13f   : > { %2796 = vmatpush3.bf16.msra.mxu1 %v3324_v16  ;;  %v1781_v49 = vadd.f32 %v3490_v5, %v1750_v28  ;;  %v964_v38 = vrot.slane %v930_v39, 1  ;;  %v1040_v44 = vmul.f32 %v3317_v13, %v3342_v26  ;;  %v965_v32 = vrot.slane %v3508_v50, 1 }
 0x140   : > { %v1782_v52 = vadd.f32 %v3490_v5, %v1751_v43  ;;  %v1452_v4 = vadd.f32 %v1390_v30, %v1312_v46  ;;  %v970_v53 = vrot.slane %v3512_v37, 1  ;;  %v3529_v56 = vmul.f32 %v3317_v13, %v3366_v34 }
 0x141   : > { %v1805_v16 = vmax.f32 %v1781_v49, 0.0  ;;  %v1012_v54 = vadd.f32 %v964_v38, %v3336_v23  ;;  %v1091_v57 = vrot.slane %v1040_v44, 2  ;;  %v1690_v63 = vsel %vm1085_vm2, %v1687_v41, %v1689_v31  ;;  %2757 = vmatmul.mubr.msk.f32.gmra.mrb[10].mxu0 %vm2121_vm3, %v2115_v55  ;;  %v3565_v44 = vld [vmem:[%s3290_s26 + $0x70] sm:$0xff] }
 0x142   : > { %v1806_v62 = vmax.f32 %v1782_v52, 0.0  ;;  %v1504_v26 = vadd.f32 %v1480_v42, %v1452_v4  ;;  %v966_v2 = vsel %vm960_vm1, %v964_v38, %v965_v32  ;;  %v1092_v23 = vrot.slane %v3529_v56, 2 }
 0x143   : > { %v1829_v33 = vmin.f32 %v1805_v16, 6.0  ;;  %v1013_v59 = vadd.f32 %v966_v2, %v880_v27  ;;  %v1153_v7 = vadd.f32 %v1091_v57, %v1012_v54  ;;  %v3543_v3 = vadd.f32 %v970_v53, %v885_v58 }
 0x144   : > { %v1830_v15 = vmin.f32 %v1806_v62, 6.0  ;;  %v1612_v17 = vadd.f32 %v1563_v35, %v1504_v26  ;;  %v1182_v41 = vmul.f32 %v3319_v14, %v3311_v10  ;;  %v1093_v21 = vsel %vm1085_vm2, %v1091_v57, %v1092_v23 }
 0x145   : > { %v1878_v42 = vrot.slane %v1829_v33, 7  ;;  %v1205_v27 = vadd.f32 %v3370_v40, %v1153_v7  ;;  %v1232_v28 = vmul.f32 %v3327_v18, %v3311_v10  ;;  %v1154_v8 = vadd.f32 %v1093_v21, %v1013_v59  ;;  %v845_v59 = vld [vmem:[%s3290_s26 + $0x78] sm:$0x1] }
 0x146   : > { %v1879_v30 = vrot.slane %v1830_v15, 7  ;;  %v1752_v31 = vadd.f32 %v1690_v63, %v1612_v17  ;;  %v3553_v35 = vmul.f32 %v3327_v18, %v3406_v61  ;;  %v1341_v36 = vmul.f32 %v3329_v19, %v3311_v10 }
 0x147   : > { %v1265_v39 = vrot.slane %v1232_v28, 1  ;;  %v1342_v43 = vmul.f32 %v3329_v19, %v3406_v61  ;;  %v1481_v40 = vmul.f32 %v3331_v20, %v3494_v25  ;;  %v1206_v58 = vadd.f32 %v1182_v41, %v1154_v8 }
 0x148   : > { %v1880_v46 = vsel %vm1877_vm4, %v1878_v42, %v1879_v30  ;;  %v1783_v49 = vadd.f32 %v3490_v5, %v1752_v31  ;;  %v1266_v38 = vrot.slane %v3553_v35, 1  ;;  %v1391_v52 = vrot.slane %v1341_v36, 2 }
 0x149   : > { %2715 = vmatprep.mubr.f32.mxu1 %v1880_v46  ;;  %v1313_v55 = vadd.f32 %v1265_v39, %v1205_v27  ;;  %v1392_v4 = vrot.slane %v1342_v43, 2  ;;  %v1482_v16 = vmul.f32 %v3331_v20, %v3482_v0  ;;  %v1532_v57 = vmul.f32 %v3338_v24, %v3482_v0 }
 0x14a   : > { %v1807_v54 = vmax.f32 %v1783_v49, 0.0  ;;  %v1267_v56 = vsel %vm960_vm1, %v1265_v39, %v1266_v38  ;;  %v3574_v62 = vmul.f32 %v3338_v24, %v3565_v44  ;;  %v1641_v33 = vmul.f32 %v3395_v51, %v3482_v0 }
 0x14b   : > { %v1314_v26 = vadd.f32 %v1267_v56, %v1206_v58  ;;  %v1393_v63 = vsel %vm1085_vm2, %v1391_v52, %v1392_v4  ;;  %v1453_v2 = vadd.f32 %v1391_v52, %v1313_v55  ;;  %v1565_v15 = vrot.slane %v1532_v57, 1  ;;  %v2116_v52 = vld [vmem:[%s3305_s20 + $0x60] sm:$0xff] }
 0x14c   : > { %v1831_v7 = vmin.f32 %v1807_v54, 6.0  ;;  %v1566_v17 = vrot.slane %v3574_v62, 1  ;;  %v1642_v41 = vmul.f32 %v3395_v51, %v3565_v44  ;;  %v1691_v27 = vrot.slane %v1641_v33, 2  ;;  %2759 = vmatprep.mubr.msk.f32.mxu0 %vm2121_vm3, %v2116_v52 }
 0x14d   : > { %v1454_v42 = vadd.f32 %v1393_v63, %v1314_v26  ;;  %v1505_v21 = vadd.f32 %v1481_v40, %v1453_v2  ;;  %v881_v28 = vmul.f32 %v3313_v11, %v3366_v34  ;;  %v3589_v39 = vmul.f32 %v3317_v13, %v845_v59  ;;  %v3620_v2 = vld [vmem:[%s3290_s26 + $0x80] sm:$0xff] }
 0x14e   : > { %v1881_v31 = vrot.slane %v1831_v7, 7  ;;  %v1567_v8 = vsel %vm960_vm1, %v1565_v15, %v1566_v17  ;;  %v1692_v35 = vrot.slane %v1642_v41, 2  ;;  %v1095_v34 = vsel %vm1085_vm2, %v1092_v23, %v1094_v60  ;;  %v3607_v60 = vld [vmem:[%s3290_s26 + $0x88] sm:$0xff] }
 0x14f   : > { %v1506_v36 = vadd.f32 %v1482_v16, %v1454_v42  ;;  %v1613_v43 = vadd.f32 %v1565_v15, %v1505_v21  ;;  %v1014_v40 = vadd.f32 %v965_v32, %v881_v28  ;;  %v1184_v49 = vmul.f32 %v3319_v14, %v3494_v25  ;;  %v2117_v23 = vld [vmem:[%s3305_s20 + $0x68] sm:$0xff] }
 0x150   : > { %v1882_v46 = vsel %vm1877_vm4, %v1879_v30, %v1881_v31  ;;  %v1693_v58 = vsel %vm1085_vm2, %v1691_v27, %v1692_v35  ;;  %v1183_v55 = vmul.f32 %v3319_v14, %v3406_v61  ;;  %v3604_v45 = vmul.f32 %v3329_v19, %v845_v59  ;;  %2760 = vmatmul.mubr.msk.f32.gmra.mrb[12].mxu0 %vm2121_vm3, %v2117_v23 }
 0x151   : > { %2716 = vmatmul.mubr.f32.vlgmr.msra.gmra.mrb[0].mxu1 %v1882_v46  ;;  %v1614_v16 = vadd.f32 %v1567_v8, %v1506_v36  ;;  %v1753_v50 = vadd.f32 %v1691_v27, %v1613_v43  ;;  %v1155_v32 = vadd.f32 %v1095_v34, %v1014_v40  ;;  %v1104_v30 = vrot.slane %v3589_v39, 2 }
 0x152   : > { %v1395_v25 = vsel %vm1085_vm2, %v1392_v4, %v1394_v22  ;;  %v1483_v54 = vmul.f32 %v3331_v20, %v3565_v44  ;;  %v1643_v56 = vmul.f32 %v3395_v51, %v845_v59  ;;  %v883_v33 = vmul.f32 %v3313_v11, %v3311_v10 }
 0x153   : > { %v1754_v57 = vadd.f32 %v1693_v58, %v1614_v16  ;;  %v1784_v26 = vadd.f32 %v3490_v5, %v1753_v50  ;;  %v1207_v63 = vadd.f32 %v1183_v55, %v1155_v32  ;;  %v1399_v6 = vrot.slane %v3604_v45, 2 }
 0x154   : > { %v1694_v22 = vrot.slane %v1643_v56, 2  ;;  %v3628_v4 = vmul.f32 %v3315_v12, %v3406_v61  ;;  %v3632_v59 = vmul.f32 %v3315_v12, %v3607_v60  ;;  %v1043_v42 = vmul.f32 %v3317_v13, %v3311_v10 }
 0x155   : > { %v1785_v7 = vadd.f32 %v3490_v5, %v1754_v57  ;;  %v1808_v15 = vmax.f32 %v1784_v26, 0.0  ;;  %v1315_v41 = vadd.f32 %v1266_v38, %v1207_v63  ;;  %v888_v21 = vmul.f32 %v3313_v11, %v3620_v2 }
 0x156   : > { %v968_v27 = vrot.slane %v3628_v4, 1  ;;  %v973_v28 = vrot.slane %v3632_v59, 1  ;;  %v3643_v31 = vmul.f32 %v3317_v13, %v3406_v61  ;;  %v1096_v40 = vrot.slane %v1043_v42, 2 }
 0x157   : > { %v1809_v8 = vmax.f32 %v1785_v7, 0.0  ;;  %v1832_v36 = vmin.f32 %v1808_v15, 6.0  ;;  %v1455_v43 = vadd.f32 %v1395_v25, %v1315_v41  ;;  %v1695_v38 = vsel %vm1085_vm2, %v1692_v35, %v1694_v22  ;;  %v3679_v41 = vld [vmem:[%s3290_s26 + $0x90] sm:$0xff] }
 0x158   : > { %v969_v10 = vsel %vm960_vm1, %v967_v47, %v968_v27  ;;  %v1097_v34 = vrot.slane %v3643_v31, 2  ;;  %v1185_v46 = vmul.f32 %v3319_v14, %v3482_v0  ;;  %v3656_v50 = vadd.f32 %v973_v28, %v888_v21 }
 0x159   : > { %v3652_v58 = vmin.f32 %v1809_v8, 6.0  ;;  %v1883_v55 = vrot.slane %v1832_v36, 7  ;;  %v1507_v52 = vadd.f32 %v1483_v54, %v1455_v43  ;;  %v1016_v16 = vadd.f32 %v969_v10, %v883_v33 }
 0x15a   : > { %v1098_v35 = vsel %vm1085_vm2, %v1096_v40, %v1097_v34  ;;  %v1156_v29 = vadd.f32 %v1096_v40, %v3450_v9  ;;  %v1234_v47 = vmul.f32 %v3327_v18, %v3482_v0  ;;  %v3667_v54 = vmul.f32 %v3327_v18, %v3565_v44 }
 0x15b   : > { %v1884_v32 = vrot.slane %v3652_v58, 7  ;;  %v1615_v23 = vadd.f32 %v1566_v17, %v1507_v52  ;;  %v1157_v25 = vadd.f32 %v1098_v35, %v1016_v16  ;;  %v1344_v26 = vmul.f32 %v3329_v19, %v3482_v0 }
 0x15c   : > { %v1208_v56 = vadd.f32 %v1184_v49, %v1156_v29  ;;  %v1268_v57 = vrot.slane %v1234_v47, 1  ;;  %v1345_v9 = vmul.f32 %v3329_v19, %v3565_v44  ;;  %v1269_v62 = vrot.slane %v3667_v54, 1 }
 0x15d   : > { %v1885_v63 = vsel %vm1877_vm4, %v1883_v55, %v1884_v32  ;;  %v1755_v33 = vadd.f32 %v1695_v38, %v1615_v23  ;;  %v1209_v22 = vadd.f32 %v1185_v46, %v1157_v25  ;;  %v1396_v4 = vrot.slane %v1344_v26, 2  ;;  %v849_v38 = vld [vmem:[%s3290_s26 + $0x98] sm:$0x1] }
 0x15e   : > { %2718 = vmatprep.mubr.f32.mxu1 %v1885_v63  ;;  %v1316_v17 = vadd.f32 %v1268_v57, %v1208_v56  ;;  %v1397_v7 = vrot.slane %v1345_v9, 2  ;;  %v1484_v49 = vmul.f32 %v3331_v20, %v3620_v2  ;;  %v1270_v42 = vsel %vm960_vm1, %v1268_v57, %v1269_v62 }
 0x15f   : > { %v1786_v15 = vadd.f32 %v3490_v5, %v1755_v33  ;;  %v1485_v21 = vmul.f32 %v3331_v20, %v3607_v60  ;;  %v1534_v31 = vmul.f32 %v3338_v24, %v3607_v60  ;;  %v1317_v8 = vadd.f32 %v1270_v42, %v1209_v22 }
 0x160   : > { %v1398_v36 = vsel %vm1085_vm2, %v1396_v4, %v1397_v7  ;;  %v1456_v43 = vadd.f32 %v1396_v4, %v1316_v17  ;;  %v3689_v40 = vmul.f32 %v3338_v24, %v3679_v41  ;;  %v1644_v58 = vmul.f32 %v3395_v51, %v3607_v60  ;;  %v2118_v17 = vld [vmem:[%s3305_s20 + $0x70] sm:$0xff] }
 0x161   : > { %v1810_v10 = vmax.f32 %v1786_v15, 0.0  ;;  %v1568_v46 = vrot.slane %v1534_v31, 1  ;;  %v1645_v55 = vmul.f32 %v3395_v51, %v3679_v41  ;;  %v1457_v52 = vadd.f32 %v1398_v36, %v1317_v8  ;;  %2762 = vmatprep.mubr.msk.f32.mxu0 %vm2121_vm3, %v2118_v17 }
 0x162   : > { %v1508_v16 = vadd.f32 %v1484_v49, %v1456_v43  ;;  %v1569_v35 = vrot.slane %v3689_v40, 1  ;;  %v884_v29 = vmul.f32 %v3313_v11, %v3406_v61  ;;  %v1696_v23 = vrot.slane %v1644_v58, 2  ;;  %v3726_v43 = vld [vmem:[%s3290_s26 + $0xa8] sm:$0xff] }
 0x163   : > { %v1834_v47 = vmin.f32 %v1810_v10, 6.0  ;;  %v1697_v25 = vrot.slane %v1645_v55, 2  ;;  %v3700_v54 = vmul.f32 %v3317_v13, %v849_v38  ;;  %v1509_v56 = vadd.f32 %v1485_v21, %v1457_v52  ;;  %v3732_v10 = vld [vmem:[%s3290_s26 + $0xa0] sm:$0xff] }
 0x164   : > { %v1570_v57 = vsel %vm960_vm1, %v1568_v46, %v1569_v35  ;;  %v1616_v26 = vadd.f32 %v1568_v46, %v1508_v16  ;;  %v1017_v9 = vadd.f32 %v968_v27, %v884_v29  ;;  %v1187_v33 = vmul.f32 %v3319_v14, %v3620_v2  ;;  %v2119_v27 = vld [vmem:[%s3305_s20 + $0x78] sm:$0xff]  ;;  %s2550_s20 = sshll.u32 %s2985_s30, 4 }
 0x165   : > { %v1886_v63 = vrot.slane %v1834_v47, 7  ;;  %v1698_v22 = vsel %vm1085_vm2, %v1696_v23, %v1697_v25  ;;  %v1100_v61 = vsel %vm1085_vm2, %v1097_v34, %v1099_v1  ;;  %v1617_v4 = vadd.f32 %v1570_v57, %v1509_v56  ;;  %2763 = vmatmul.mubr.msk.f32.gmra.mrb[14].mxu0 %vm2121_vm3, %v2119_v27  ;;  %s2393_s1 = sadd.s32 %s2550_s20, %s2543_s15 }
 0x166   : > { %v1756_v49 = vadd.f32 %v1696_v23, %v1616_v26  ;;  %v1158_v15 = vadd.f32 %v1100_v61, %v1017_v9  ;;  %v1186_v42 = vmul.f32 %v3319_v14, %v3565_v44  ;;  %v1109_v21 = vrot.slane %v3700_v54, 2  ;;  %s2544_s16 = sshll.u32 %s2393_s1, 7 }
 0x167   : > { %v1887_v2 = vsel %vm1877_vm4, %v1884_v32, %v1886_v63  ;;  %v3717_v48 = vmul.f32 %v3329_v19, %v849_v38  ;;  %v1400_v1 = vsel %vm1085_vm2, %v1397_v7, %v1399_v6  ;;  %v1757_v34 = vadd.f32 %v1698_v22, %v1617_v4  ;;  %s4252_s22 = scalar_lea.hbm %s4320_s8, %s2544_s16 }
 0x168   : > { %2719 = vmatmul.mubr.f32.gmra.mrb[2].mxu1 %v1887_v2  ;;  %v1787_v31 = vadd.f32 %v3490_v5, %v1756_v49  ;;  %v1210_v8 = vadd.f32 %v1186_v42, %v1158_v15  ;;  %v1646_v36 = vmul.f32 %v3395_v51, %v849_v38  ;;  %v1486_v40 = vmul.f32 %v3331_v20, %v3679_v41 }
 0x169   : > { %v1404_v32 = vrot.slane %v3717_v48, 2  ;;  %v886_v45 = vmul.f32 %v3313_v11, %v3482_v0  ;;  %v3738_v6 = vmul.f32 %v3315_v12, %v3565_v44  ;;  %v1788_v7 = vadd.f32 %v3490_v5, %v1757_v34 }
 0x16a   : > { %v1811_v46 = vmax.f32 %v1787_v31, 0.0  ;;  %v1318_v38 = vadd.f32 %v1269_v62, %v1210_v8  ;;  %v1699_v58 = vrot.slane %v1646_v36, 2  ;;  %v3743_v55 = vmul.f32 %v3315_v12, %v3726_v43 }
 0x16b   : > { %v971_v52 = vrot.slane %v3738_v6, 1  ;;  %v1046_v16 = vmul.f32 %v3317_v13, %v3482_v0  ;;  %v1047_v29 = vmul.f32 %v3317_v13, %v3565_v44  ;;  %v1812_v47 = vmax.f32 %v1788_v7, 0.0 }
 0x16c   : > { %v1835_v23 = vmin.f32 %v1811_v46, 6.0  ;;  %v1458_v56 = vadd.f32 %v1400_v1, %v1318_v38  ;;  %v891_v57 = vmul.f32 %v3313_v11, %v3732_v10  ;;  %v976_v26 = vrot.slane %v3743_v55, 1  ;;  %v3783_v38 = vld [vmem:[%s3290_s26 + $0xb0] sm:$0xff] }
 0x16d   : > { %v972_v62 = vsel %vm960_vm1, %v970_v53, %v971_v52  ;;  %v1101_v9 = vrot.slane %v1046_v16, 2  ;;  %v1102_v63 = vrot.slane %v1047_v29, 2  ;;  %v1836_v0 = vmin.f32 %v1812_v47, 6.0 }
 0x16e   : > { %v1888_v22 = vrot.slane %v1835_v23, 7  ;;  %v1510_v61 = vadd.f32 %v1486_v40, %v1458_v56  ;;  %v1019_v17 = vadd.f32 %v972_v62, %v886_v45  ;;  %v1700_v4 = vsel %vm1085_vm2, %v1697_v25, %v1699_v58  ;;  %v853_v62 = vld [vmem:[%s3290_s26 + $0xb8] sm:$0x1] }
 0x16f   : > { %v1103_v49 = vsel %vm1085_vm2, %v1101_v9, %v1102_v63  ;;  %v1159_v15 = vadd.f32 %v1101_v9, %v3543_v3  ;;  %v1188_v42 = vmul.f32 %v3319_v14, %v3607_v60  ;;  %v1889_v37 = vrot.slane %v1836_v0, 7 }
 0x170   : > { %v1618_v27 = vadd.f32 %v1569_v35, %v1510_v61  ;;  %v3765_v53 = vadd.f32 %v976_v26, %v891_v57  ;;  %v1160_v2 = vadd.f32 %v1103_v49, %v1019_v17  ;;  %v1236_v34 = vmul.f32 %v3327_v18, %v3607_v60 }
 0x171   : > { %v1211_v1 = vadd.f32 %v1187_v33, %v1159_v15  ;;  %v3771_v25 = vmul.f32 %v3327_v18, %v3679_v41  ;;  %v1347_v3 = vmul.f32 %v3329_v19, %v3607_v60  ;;  %v1890_v31 = vsel %vm1877_vm4, %v1888_v22, %v1889_v37 }
 0x172   : > { %v1758_v35 = vadd.f32 %v1700_v4, %v1618_v27  ;;  %v1212_v8 = vadd.f32 %v1188_v42, %v1160_v2  ;;  %v1348_v36 = vmul.f32 %v3329_v19, %v3679_v41  ;;  %2721 = vmatprep.mubr.f32.mxu1 %v1890_v31  ;;  %v1271_v33 = vrot.slane %v1236_v34, 1 }
 0x173   : > { %v1272_v40 = vrot.slane %v3771_v25, 1  ;;  %v1401_v45 = vrot.slane %v1347_v3, 2  ;;  %v1487_v7 = vmul.f32 %v3331_v20, %v3732_v10  ;;  %v1488_v16 = vmul.f32 %v3331_v20, %v3726_v43 }
 0x174   : > { %v1789_v46 = vadd.f32 %v3490_v5, %v1758_v35  ;;  %v1402_v58 = vrot.slane %v1348_v36, 2  ;;  %v1536_v29 = vmul.f32 %v3338_v24, %v3726_v43  ;;  %v1319_v23 = vadd.f32 %v1271_v33, %v1211_v1 }
 0x175   : > { %v1273_v47 = vsel %vm960_vm1, %v1271_v33, %v1272_v40  ;;  %v3792_v56 = vmul.f32 %v3338_v24, %v3783_v38  ;;  %v1647_v57 = vmul.f32 %v3395_v51, %v3726_v43  ;;  %v1648_v49 = vmul.f32 %v3395_v51, %v3783_v38 }
 0x176   : > { %v1813_v9 = vmax.f32 %v1789_v46, 0.0  ;;  %v1320_v0 = vadd.f32 %v1273_v47, %v1212_v8  ;;  %v1403_v22 = vsel %vm1085_vm2, %v1401_v45, %v1402_v58  ;;  %v1571_v61 = vrot.slane %v1536_v29, 1 }
 0x177   : > { %v1459_v17 = vadd.f32 %v1401_v45, %v1319_v23  ;;  %v1572_v4 = vrot.slane %v3792_v56, 1  ;;  %v1701_v15 = vrot.slane %v1647_v57, 2  ;;  %v887_v2 = vmul.f32 %v3313_v11, %v3565_v44 }
 0x178   : > { %v1837_v42 = vmin.f32 %v1813_v9, 6.0  ;;  %v1460_v27 = vadd.f32 %v1403_v22, %v1320_v0  ;;  %v3804_v1 = vmul.f32 %v3317_v13, %v853_v62  ;;  %v1702_v3 = vrot.slane %v1648_v49, 2  ;;  %v3835_v9 = vld [vmem:[%s3290_s26 + $0xc0] sm:$0xff] }
 0x179   : > { %v1511_v34 = vadd.f32 %v1487_v7, %v1459_v17  ;;  %v1573_v25 = vsel %vm960_vm1, %v1571_v61, %v1572_v4  ;;  %v1105_v31 = vsel %vm1085_vm2, %v1102_v63, %v1104_v30  ;;  %v1190_v8 = vmul.f32 %v3319_v14, %v3732_v10 }
 0x17a   : > { %v1891_v35 = vrot.slane %v1837_v42, 7  ;;  %v1512_v36 = vadd.f32 %v1488_v16, %v1460_v27  ;;  %v1020_v44 = vadd.f32 %v971_v52, %v887_v2  ;;  %v1703_v45 = vsel %vm1085_vm2, %v1701_v15, %v1702_v3  ;;  %v3825_v16 = vld [vmem:[%s3290_s26 + $0xc8] sm:$0xff] }
 0x17b   : > { %v1619_v33 = vadd.f32 %v1571_v61, %v1511_v34  ;;  %v1189_v7 = vmul.f32 %v3319_v14, %v3679_v41  ;;  %v3820_v46 = vmul.f32 %v3329_v19, %v853_v62  ;;  %v1114_v63 = vrot.slane %v3804_v1, 2 }
 0x17c   : > { %v1892_v39 = vsel %vm1877_vm4, %v1889_v37, %v1891_v35  ;;  %v1620_v30 = vadd.f32 %v1573_v25, %v1512_v36  ;;  %v1161_v10 = vadd.f32 %v1105_v31, %v1020_v44  ;;  %v1405_v52 = vsel %vm1085_vm2, %v1402_v58, %v1404_v32 }
 0x17d   : > { %2722 = vmatmul.mubr.f32.gmra.mrb[4].mxu1 %v1892_v39  ;;  %v1759_v6 = vadd.f32 %v1701_v15, %v1619_v33  ;;  %v1409_v29 = vrot.slane %v3820_v46, 2  ;;  %v1649_v47 = vmul.f32 %v3395_v51, %v853_v62  ;;  %v1489_v37 = vmul.f32 %v3331_v20, %v3783_v38 }
 0x17e   : > { %v1760_v23 = vadd.f32 %v1703_v45, %v1620_v30  ;;  %v1213_v57 = vadd.f32 %v1189_v7, %v1161_v10  ;;  %v889_v0 = vmul.f32 %v3313_v11, %v3607_v60  ;;  %v3842_v48 = vmul.f32 %v3315_v12, %v3679_v41 }
 0x17f   : > { %v1790_v22 = vadd.f32 %v3490_v5, %v1759_v6  ;;  %v1704_v61 = vrot.slane %v1649_v47, 2  ;;  %v3846_v32 = vmul.f32 %v3315_v12, %v3825_v16  ;;  %v1049_v17 = vmul.f32 %v3317_v13, %v3607_v60 }
 0x180   : > { %v1791_v58 = vadd.f32 %v3490_v5, %v1760_v23  ;;  %v1321_v62 = vadd.f32 %v1272_v40, %v1213_v57  ;;  %v3853_v49 = vmul.f32 %v3317_v13, %v3679_v41  ;;  %v894_v42 = vmul.f32 %v3313_v11, %v3835_v9 }
 0x181   : > { %v1814_v15 = vmax.f32 %v1790_v22, 0.0  ;;  %v974_v27 = vrot.slane %v3842_v48, 1  ;;  %v979_v2 = vrot.slane %v3846_v32, 1  ;;  %v1106_v31 = vrot.slane %v1049_v17, 2  ;;  %v3890_v17 = vld [vmem:[%s3290_s26 + $0xd0] sm:$0xff] }
 0x182   : > { %v1815_v34 = vmax.f32 %v1791_v58, 0.0  ;;  %v1461_v25 = vadd.f32 %v1405_v52, %v1321_v62  ;;  %v1107_v40 = vrot.slane %v3853_v49, 2  ;;  %v1705_v60 = vsel %vm1085_vm2, %v1702_v3, %v1704_v61 }
 0x183   : > { %v1838_v35 = vmin.f32 %v1814_v15, 6.0  ;;  %v975_v36 = vsel %vm960_vm1, %v973_v28, %v974_v27  ;;  %v1191_v44 = vmul.f32 %v3319_v14, %v3726_v43  ;;  %v3869_v10 = vadd.f32 %v979_v2, %v894_v42 }
 0x184   : > { %v1839_v33 = vmin.f32 %v1815_v34, 6.0  ;;  %v1513_v45 = vadd.f32 %v1489_v37, %v1461_v25  ;;  %v1022_v7 = vadd.f32 %v975_v36, %v889_v0  ;;  %v1108_v39 = vsel %vm1085_vm2, %v1106_v31, %v1107_v40 }
 0x185   : > { %v1893_v30 = vrot.slane %v1838_v35, 7  ;;  %v1162_v6 = vadd.f32 %v1106_v31, %v3656_v50  ;;  %v1238_v59 = vmul.f32 %v3327_v18, %v3726_v43  ;;  %v3878_v47 = vmul.f32 %v3327_v18, %v3783_v38 }
 0x186   : > { %v1894_v3 = vrot.slane %v1839_v33, 7  ;;  %v1621_v28 = vadd.f32 %v1572_v4, %v1513_v45  ;;  %v1163_v52 = vadd.f32 %v1108_v39, %v1022_v7  ;;  %v1350_v37 = vmul.f32 %v3329_v19, %v3726_v43 }
 0x187   : > { %v1214_v23 = vadd.f32 %v1190_v8, %v1162_v6  ;;  %v1274_v57 = vrot.slane %v1238_v59, 1  ;;  %v1351_v50 = vmul.f32 %v3329_v19, %v3783_v38  ;;  %v1275_v56 = vrot.slane %v3878_v47, 1 }
 0x188   : > { %v1895_v0 = vsel %vm1877_vm4, %v1893_v30, %v1894_v3  ;;  %v1761_v22 = vadd.f32 %v1705_v60, %v1621_v28  ;;  %v1215_v61 = vadd.f32 %v1191_v44, %v1163_v52  ;;  %v1406_v48 = vrot.slane %v1350_v37, 2  ;;  %v857_v60 = vld [vmem:[%s3290_s26 + $0xd8] sm:$0x1] }
 0x189   : > { %2724 = vmatprep.mubr.f32.mxu1 %v1895_v0  ;;  %v1322_v4 = vadd.f32 %v1274_v57, %v1214_v23  ;;  %v1407_v58 = vrot.slane %v1351_v50, 2  ;;  %v1490_v8 = vmul.f32 %v3331_v20, %v3835_v9  ;;  %v1276_v49 = vsel %vm960_vm1, %v1274_v57, %v1275_v56 }
 0x18a   : > { %v1792_v62 = vadd.f32 %v3490_v5, %v1761_v22  ;;  %v1491_v15 = vmul.f32 %v3331_v20, %v3825_v16  ;;  %v1538_v42 = vmul.f32 %v3338_v24, %v3825_v16  ;;  %v1323_v34 = vadd.f32 %v1276_v49, %v1215_v61 }
 0x18b   : > { %v1408_v25 = vsel %vm1085_vm2, %v1406_v48, %v1407_v58  ;;  %v1462_v31 = vadd.f32 %v1406_v48, %v1322_v4  ;;  %v3900_v35 = vmul.f32 %v3338_v24, %v3890_v17  ;;  %v1650_v33 = vmul.f32 %v3395_v51, %v3825_v16 }
 0x18c   : > { %v1816_v36 = vmax.f32 %v1792_v62, 0.0  ;;  %v1574_v44 = vrot.slane %v1538_v42, 1  ;;  %v1651_v45 = vmul.f32 %v3395_v51, %v3890_v17  ;;  %v1463_v7 = vadd.f32 %v1408_v25, %v1323_v34  ;;  %v3933_v34 = vld [vmem:[%s3290_s26 + $0xe8] sm:$0xff] }
 0x18d   : > { %v1514_v39 = vadd.f32 %v1490_v8, %v1462_v31  ;;  %v1575_v30 = vrot.slane %v3900_v35, 1  ;;  %v890_v6 = vmul.f32 %v3313_v11, %v3679_v41  ;;  %v1706_v28 = vrot.slane %v1650_v33, 2  ;;  %v3939_v31 = vld [vmem:[%s3290_s26 + $0xe0] sm:$0xff] }
 0x18e   : > { %v1840_v59 = vmin.f32 %v1816_v36, 6.0  ;;  %v1707_v52 = vrot.slane %v1651_v45, 2  ;;  %v3911_v47 = vmul.f32 %v3317_v13, %v857_v60  ;;  %v1515_v23 = vadd.f32 %v1491_v15, %v1463_v7 }
 0x18f   : > { %v1576_v57 = vsel %vm960_vm1, %v1574_v44, %v1575_v30  ;;  %v1622_v37 = vadd.f32 %v1574_v44, %v1514_v39  ;;  %v1023_v50 = vadd.f32 %v974_v27, %v890_v6  ;;  %v1193_v22 = vmul.f32 %v3319_v14, %v3835_v9 }
 0x190   : > { %v1896_v0 = vrot.slane %v1840_v59, 7  ;;  %v1708_v61 = vsel %vm1085_vm2, %v1706_v28, %v1707_v52  ;;  %v1110_v41 = vsel %vm1085_vm2, %v1107_v40, %v1109_v21  ;;  %v1623_v4 = vadd.f32 %v1576_v57, %v1515_v23 }
 0x191   : > { %v1762_v48 = vadd.f32 %v1706_v28, %v1622_v37  ;;  %v1164_v8 = vadd.f32 %v1110_v41, %v1023_v50  ;;  %v1192_v62 = vmul.f32 %v3319_v14, %v3783_v38  ;;  %v1119_v49 = vrot.slane %v3911_v47, 2 }
 0x192   : > { %v1897_v27 = vsel %vm1877_vm4, %v1894_v3, %v1896_v0  ;;  %v3925_v9 = vmul.f32 %v3329_v19, %v857_v60  ;;  %v1410_v54 = vsel %vm1085_vm2, %v1407_v58, %v1409_v29  ;;  %v1763_v21 = vadd.f32 %v1708_v61, %v1623_v4 }
 0x193   : > { %2725 = vmatmul.mubr.f32.gmra.mrb[6].mxu1 %v1897_v27  ;;  %v1793_v40 = vadd.f32 %v3490_v5, %v1762_v48  ;;  %v1216_v15 = vadd.f32 %v1192_v62, %v1164_v8  ;;  %v1652_v42 = vmul.f32 %v3395_v51, %v857_v60  ;;  %v1492_v25 = vmul.f32 %v3331_v20, %v3890_v17 }
 0x194   : > { %v1414_v3 = vrot.slane %v3925_v9, 2  ;;  %v892_v46 = vmul.f32 %v3313_v11, %v3726_v43  ;;  %v3945_v29 = vmul.f32 %v3315_v12, %v3783_v38  ;;  %v1794_v58 = vadd.f32 %v3490_v5, %v1763_v21 }
 0x195   : > { %v1817_v35 = vmax.f32 %v1793_v40, 0.0  ;;  %v1324_v51 = vadd.f32 %v1275_v56, %v1216_v15  ;;  %v1709_v60 = vrot.slane %v1652_v42, 2  ;;  %v3950_v36 = vmul.f32 %v3315_v12, %v3933_v34 }
 0x196   : > { %v977_v44 = vrot.slane %v3945_v29, 1  ;;  %v1052_v33 = vmul.f32 %v3317_v13, %v3726_v43  ;;  %v1053_v45 = vmul.f32 %v3317_v13, %v3783_v38  ;;  %v1818_v7 = vmax.f32 %v1794_v58, 0.0 }
 0x197   : > { %v1841_v39 = vmin.f32 %v1817_v35, 6.0  ;;  %v1464_v6 = vadd.f32 %v1410_v54, %v1324_v51  ;;  %v897_v59 = vmul.f32 %v3313_v11, %v3939_v31  ;;  %v982_v28 = vrot.slane %v3950_v36, 1  ;;  %v3990_v35 = vld [vmem:[%s3290_s26 + $0xf0] sm:$0xff] }
 0x198   : > { %v978_v56 = vsel %vm960_vm1, %v976_v26, %v977_v44  ;;  %v1111_v23 = vrot.slane %v1052_v33, 2  ;;  %v1112_v57 = vrot.slane %v1053_v45, 2  ;;  %v1842_v43 = vmin.f32 %v1818_v7, 6.0 }
 0x199   : > { %v1898_v37 = vrot.slane %v1841_v39, 7  ;;  %v1516_v50 = vadd.f32 %v1492_v25, %v1464_v6  ;;  %v1025_v0 = vadd.f32 %v978_v56, %v892_v46  ;;  %v1710_v61 = vsel %vm1085_vm2, %v1707_v52, %v1709_v60  ;;  %v4004_v6 = vld [vmem:[%s4315_s3 + $0x8] ss:$0 sm:$0xff]  ;;  %v861_v56 = vld [vmem:[%s3290_s26 + $0xf8] sm:$0x1] }
 0x19a   : > { %v1113_v41 = vsel %vm1085_vm2, %v1111_v23, %v1112_v57  ;;  %v1165_v4 = vadd.f32 %v1111_v23, %v3765_v53  ;;  %v1194_v48 = vmul.f32 %v3319_v14, %v3825_v16  ;;  %v1899_v55 = vrot.slane %v1842_v43, 7 }
 0x19b   : > { %v1624_v8 = vadd.f32 %v1575_v30, %v1516_v50  ;;  %v3972_v26 = vadd.f32 %v982_v28, %v897_v59  ;;  %v1166_v62 = vadd.f32 %v1113_v41, %v1025_v0  ;;  %v1240_v54 = vmul.f32 %v3327_v18, %v3825_v16 }
 0x19c   : > { %v1217_v27 = vadd.f32 %v1193_v22, %v1165_v4  ;;  %v3978_v52 = vmul.f32 %v3327_v18, %v3890_v17  ;;  %v1353_v53 = vmul.f32 %v3329_v19, %v3825_v16  ;;  %v1900_v21 = vsel %vm1877_vm4, %v1898_v37, %v1899_v55 }
 0x19d   : > { %v1764_v30 = vadd.f32 %v1710_v61, %v1624_v8  ;;  %v1218_v40 = vadd.f32 %v1194_v48, %v1166_v62  ;;  %v1354_v15 = vmul.f32 %v3329_v19, %v3890_v17  ;;  %2727 = vmatprep.mubr.f32.mxu1 %v1900_v21  ;;  %v1277_v22 = vrot.slane %v1240_v54, 1 }
 0x19e   : > { %v1278_v42 = vrot.slane %v3978_v52, 1  ;;  %v1411_v25 = vrot.slane %v1353_v53, 2  ;;  %v1493_v46 = vmul.f32 %v3331_v20, %v3939_v31  ;;  %v1494_v60 = vmul.f32 %v3331_v20, %v3933_v34 }
 0x19f   : > { %v1795_v58 = vadd.f32 %v3490_v5, %v1764_v30  ;;  %v1412_v51 = vrot.slane %v1354_v15, 2  ;;  %v1540_v33 = vmul.f32 %v3338_v24, %v3933_v34  ;;  %v1325_v7 = vadd.f32 %v1277_v22, %v1217_v27 }
 0x1a0   : > { %v1279_v45 = vsel %vm960_vm1, %v1277_v22, %v1278_v42  ;;  %v3999_v39 = vmul.f32 %v3338_v24, %v3990_v35  ;;  %v1653_v59 = vmul.f32 %v4004_v6, %v3933_v34  ;;  %v1654_v41 = vmul.f32 %v4004_v6, %v3990_v35 }
 0x1a1   : > { %v1819_v23 = vmax.f32 %v1795_v58, 0.0  ;;  %v1326_v43 = vadd.f32 %v1279_v45, %v1218_v40  ;;  %v1413_v37 = vsel %vm1085_vm2, %v1411_v25, %v1412_v51  ;;  %v1577_v50 = vrot.slane %v1540_v33, 1 }
 0x1a2   : > { %v1465_v0 = vadd.f32 %v1411_v25, %v1325_v7  ;;  %v1578_v61 = vrot.slane %v3999_v39, 1  ;;  %v1711_v4 = vrot.slane %v1653_v59, 2  ;;  %v893_v62 = vmul.f32 %v3313_v11, %v3783_v38 }
 0x1a3   : > { %v1843_v48 = vmin.f32 %v1819_v23, 6.0  ;;  %v1466_v8 = vadd.f32 %v1413_v37, %v1326_v43  ;;  %v4016_v27 = vmul.f32 %v3317_v13, %v861_v56  ;;  %v1712_v53 = vrot.slane %v1654_v41, 2 }
 0x1a4   : > { %v1517_v54 = vadd.f32 %v1493_v46, %v1465_v0  ;;  %v1579_v52 = vsel %vm960_vm1, %v1577_v50, %v1578_v61  ;;  %v1115_v21 = vsel %vm1085_vm2, %v1112_v57, %v1114_v63  ;;  %v1196_v40 = vmul.f32 %v3319_v14, %v3939_v31 }
 0x1a5   : > { %v1901_v30 = vrot.slane %v1843_v48, 7  ;;  %v1518_v15 = vadd.f32 %v1494_v60, %v1466_v8  ;;  %v1026_v22 = vadd.f32 %v977_v44, %v893_v62  ;;  %v1713_v25 = vsel %vm1085_vm2, %v1711_v4, %v1712_v53 }
 0x1a6   : > { %v1625_v38 = vadd.f32 %v1577_v50, %v1517_v54  ;;  %v1195_v46 = vmul.f32 %v3319_v14, %v3890_v17  ;;  %v4030_v58 = vmul.f32 %v3329_v19, %v861_v56  ;;  %v1124_v57 = vrot.slane %v4016_v27, 2 }
 0x1a7   : > { %v1902_v1 = vsel %vm1877_vm4, %v1899_v55, %v1901_v30  ;;  %v1626_v63 = vadd.f32 %v1579_v52, %v1518_v15  ;;  %v1167_v33 = vadd.f32 %v1115_v21, %v1026_v22  ;;  %v1415_v29 = vsel %vm1085_vm2, %v1412_v51, %v1414_v3 }
 0x1a8   : > { %2728 = vmatmul.mubr.f32.gmra.mrb[8].mxu1 %v1902_v1  ;;  %v1765_v31 = vadd.f32 %v1711_v4, %v1625_v38  ;;  %v1419_v44 = vrot.slane %v4030_v58, 2  ;;  %v1655_v60 = vmul.f32 %v4004_v6, %v861_v56  ;;  %v895_v39 = vmul.f32 %v3313_v11, %v3825_v16 }
 0x1a9   : > { %v1766_v45 = vadd.f32 %v1713_v25, %v1626_v63  ;;  %v1219_v7 = vadd.f32 %v1195_v46, %v1167_v33  ;;  %v4043_v55 = vmul.f32 %v3315_v12, %v3890_v17  ;;  %v1055_v9 = vmul.f32 %v3317_v13, %v3825_v16  ;;  %v862_v46 = vld [vmem:[%s3290_s26 + $0x100] sm:$0xff] }
 0x1aa   : > { %v1796_v59 = vadd.f32 %v3490_v5, %v1765_v31  ;;  %v1714_v23 = vrot.slane %v1655_v60, 2  ;;  %v4050_v3 = vmul.f32 %v3317_v13, %v3890_v17  ;;  %v1495_v43 = vmul.f32 %v3331_v20, %v3990_v35 }
 0x1ab   : > { %v1797_v51 = vadd.f32 %v3490_v5, %v1766_v45  ;;  %v1327_v56 = vadd.f32 %v1278_v42, %v1219_v7  ;;  %v980_v37 = vrot.slane %v4043_v55, 1  ;;  %v1116_v0 = vrot.slane %v1055_v9, 2  ;;  %v4083_v7 = vld [vmem:[%s3290_s26 + $0x108] sm:$0xff] }
 0x1ac   : > { %v1820_v50 = vmax.f32 %v1796_v59, 0.0  ;;  %v1117_v41 = vrot.slane %v4050_v3, 2  ;;  %v1197_v4 = vmul.f32 %v3319_v14, %v3933_v34  ;;  %v1715_v8 = vsel %vm1085_vm2, %v1712_v53, %v1714_v23 }
 0x1ad   : > { %v1821_v16 = vmax.f32 %v1797_v51, 0.0  ;;  %v1467_v48 = vadd.f32 %v1415_v29, %v1327_v56  ;;  %v981_v5 = vsel %vm960_vm1, %v979_v2, %v980_v37  ;;  %v1168_v52 = vadd.f32 %v1116_v0, %v3869_v10  ;;  %v4096_v51 = vld [vmem:[%s4316_s4] ss:$0 sm:$0xff] }
 0x1ae   : > { %v1844_v42 = vmin.f32 %v1820_v50, 6.0  ;;  %v1028_v62 = vadd.f32 %v981_v5, %v895_v39  ;;  %v1118_v54 = vsel %vm1085_vm2, %v1116_v0, %v1117_v41  ;;  %v1242_v15 = vmul.f32 %v3327_v18, %v3933_v34 }
 0x1af   : > { %v4065_v21 = vmin.f32 %v1821_v16, 6.0  ;;  %v1519_v30 = vadd.f32 %v1495_v43, %v1467_v48  ;;  %v4071_v53 = vmul.f32 %v3327_v18, %v3990_v35  ;;  %v1220_v2 = vadd.f32 %v1196_v40, %v1168_v52 }
 0x1b0   : > { %v1903_v32 = vrot.slane %v1844_v42, 7  ;;  %v1169_v22 = vadd.f32 %v1118_v54, %v1028_v62  ;;  %v1356_v38 = vmul.f32 %v3329_v19, %v3933_v34  ;;  %v1280_v1 = vrot.slane %v1242_v15, 1 }
 0x1b1   : > { %v1904_v10 = vrot.slane %v4065_v21, 7  ;;  %v1627_v25 = vadd.f32 %v1578_v61, %v1519_v30  ;;  %v1281_v63 = vrot.slane %v4071_v53, 1  ;;  %v1357_v31 = vmul.f32 %v3329_v19, %v3990_v35  ;;  %v4087_v61 = vld [vmem:[%s3290_s26 + $0x110] sm:$0xff]  ;;  %v865_v30 = vld [vmem:[%s3290_s26 + $0x118] sm:$0x1] }
 0x1b2   : > { %v1221_v33 = vadd.f32 %v1197_v4, %v1169_v22  ;;  %v1416_v29 = vrot.slane %v1356_v38, 2  ;;  %v1496_v60 = vmul.f32 %v3331_v20, %v862_v46  ;;  %v1328_v55 = vadd.f32 %v1280_v1, %v1220_v2 }
 0x1b3   : > { %v1905_v40 = vsel %vm1877_vm4, %v1903_v32, %v1904_v10  ;;  %v1767_v45 = vadd.f32 %v1715_v8, %v1627_v25  ;;  %v1282_v39 = vsel %vm960_vm1, %v1280_v1, %v1281_v63  ;;  %v1417_v23 = vrot.slane %v1357_v31, 2 }
 0x1b4   : > { %2730 = vmatprep.mubr.f32.mxu1 %v1905_v40  ;;  %v1329_v59 = vadd.f32 %v1282_v39, %v1221_v33  ;;  %v1497_v9 = vmul.f32 %v3331_v20, %v4083_v7  ;;  %v1542_v3 = vmul.f32 %v3338_v24, %v4083_v7  ;;  %v1468_v43 = vadd.f32 %v1416_v29, %v1328_v55 }
 0x1b5   : > { %v1798_v56 = vadd.f32 %v4096_v51, %v1767_v45  ;;  %v1543_v50 = vmul.f32 %v3338_v24, %v4087_v61  ;;  %v1656_v0 = vmul.f32 %v4004_v6, %v4083_v7  ;;  %v1418_v4 = vsel %vm1085_vm2, %v1416_v29, %v1417_v23 }
 0x1b6   : > { %v1580_v16 = vrot.slane %v1542_v3, 1  ;;  %v1657_v48 = vmul.f32 %v4004_v6, %v4087_v61  ;;  %v896_v8 = vmul.f32 %v3313_v11, %v3890_v17  ;;  %v1469_v42 = vadd.f32 %v1418_v4, %v1329_v59 }
 0x1b7   : > { %v1822_v5 = vmax.f32 %v1798_v56, 0.0  ;;  %v1520_v62 = vadd.f32 %v1496_v60, %v1468_v43  ;;  %v1581_v54 = vrot.slane %v1543_v50, 1  ;;  %v1716_v52 = vrot.slane %v1656_v0, 2 }
 0x1b8   : > { %v1717_v21 = vrot.slane %v1657_v48, 2  ;;  %v1029_v15 = vadd.f32 %v980_v37, %v896_v8  ;;  %v1120_v53 = vsel %vm1085_vm2, %v1117_v41, %v1119_v49  ;;  %v1521_v22 = vadd.f32 %v1497_v9, %v1469_v42 }
 0x1b9   : > { %v1846_v32 = vmin.f32 %v1822_v5, 6.0  ;;  %v1582_v2 = vsel %vm960_vm1, %v1580_v16, %v1581_v54  ;;  %v1628_v38 = vadd.f32 %v1580_v16, %v1520_v62  ;;  %v1199_v25 = vmul.f32 %v3319_v14, %v862_v46 }
 0x1ba   : > { %v1718_v17 = vsel %vm1085_vm2, %v1716_v52, %v1717_v21  ;;  %v1170_v1 = vadd.f32 %v1120_v53, %v1029_v15  ;;  %v1198_v33 = vmul.f32 %v3319_v14, %v3990_v35  ;;  %v1629_v29 = vadd.f32 %v1582_v2, %v1521_v22  ;;  %v867_v2 = vld [vmem:[%s3290_s26 + $0x128] sm:$0xff] }
 0x1bb   : > { %v1906_v31 = vrot.slane %v1846_v32, 7  ;;  %v1768_v37 = vadd.f32 %v1716_v52, %v1628_v38  ;;  %v4118_v47 = vmul.f32 %v3329_v19, %v865_v30  ;;  %v1420_v41 = vsel %vm1085_vm2, %v1417_v23, %v1419_v44  ;;  %v866_v52 = vld [vmem:[%s3290_s26 + $0x120] sm:$0xff] }
 0x1bc   : > { %v1222_v49 = vadd.f32 %v1198_v33, %v1170_v1  ;;  %v1498_v46 = vmul.f32 %v3331_v20, %v4087_v61  ;;  %v1658_v60 = vmul.f32 %v4004_v6, %v865_v30  ;;  %v1769_v45 = vadd.f32 %v1718_v17, %v1629_v29 }
 0x1bd   : > { %v1907_v40 = vsel %vm1877_vm4, %v1904_v10, %v1906_v31  ;;  %v1799_v39 = vadd.f32 %v4096_v51, %v1768_v37  ;;  %v898_v55 = vmul.f32 %v3313_v11, %v3933_v34  ;;  %v4132_v58 = vmul.f32 %v3315_v12, %v3990_v35 }
 0x1be   : > { %2731 = vmatmul.mubr.f32.gmra.mrb[10].mxu1 %v1907_v40  ;;  %v1330_v59 = vadd.f32 %v1281_v63, %v1222_v49  ;;  %v1719_v9 = vrot.slane %v1658_v60, 2  ;;  %v1058_v44 = vmul.f32 %v3317_v13, %v3933_v34  ;;  %v1800_v23 = vadd.f32 %v4096_v51, %v1769_v45 }
 0x1bf   : > { %v1823_v3 = vmax.f32 %v1799_v39, 0.0  ;;  %v1059_v10 = vmul.f32 %v3317_v13, %v3990_v35  ;;  %v1200_v56 = vmul.f32 %v3319_v14, %v4083_v7  ;;  %v983_v50 = vrot.slane %v4132_v58, 1 }
 0x1c0   : > { %v1470_v43 = vadd.f32 %v1420_v41, %v1330_v59  ;;  %v1720_v63 = vsel %vm1085_vm2, %v1717_v21, %v1719_v9  ;;  %v1121_v12 = vrot.slane %v1058_v44, 2  ;;  %v1824_v0 = vmax.f32 %v1800_v23, 0.0 }
 0x1c1   : > { %v1847_v4 = vmin.f32 %v1823_v3, 6.0  ;;  %v1122_v16 = vrot.slane %v1059_v10, 2  ;;  %v1244_v34 = vmul.f32 %v3327_v18, %v4083_v7  ;;  %v984_v13 = vsel %vm960_vm1, %v982_v28, %v983_v50  ;;  %v868_v28 = vld [vmem:[%s3290_s26 + $0x130] sm:$0xff] }
 0x1c2   : > { %v1522_v48 = vadd.f32 %v1498_v46, %v1470_v43  ;;  %v1171_v8 = vadd.f32 %v1121_v12, %v3972_v26  ;;  %v4151_v5 = vmul.f32 %v3327_v18, %v4087_v61  ;;  %v1848_v42 = vmin.f32 %v1824_v0, 6.0  ;;  %v869_v0 = vld [vmem:[%s3290_s26 + $0x138] sm:$0x1]  ;;  %s2913_s26 = scalar_lea.vmem %s2912_s13, 4096 }
 0x1c3   : > { %v1908_v62 = vrot.slane %v1847_v4, 7  ;;  %v1031_v21 = vadd.f32 %v984_v13, %v898_v55  ;;  %v1123_v30 = vsel %vm1085_vm2, %v1121_v12, %v1122_v16  ;;  %v1283_v32 = vrot.slane %v1244_v34, 1  ;;  %p2915_p5 = scmp.lt.s32.totalorder %s2913_s26, %s2907_s25 }
 0x1c4   : > { %v1630_v15 = vadd.f32 %v1581_v54, %v1522_v48  ;;  %v1223_v53 = vadd.f32 %v1199_v25, %v1171_v8  ;;  %v1284_v22 = vrot.slane %v4151_v5, 1  ;;  %v1909_v36 = vrot.slane %v1848_v42, 7 }
 0x1c5   : > { %v1172_v38 = vadd.f32 %v1123_v30, %v1031_v21  ;;  %v1359_v26 = vmul.f32 %v3329_v19, %v4083_v7  ;;  %v1360_v18 = vmul.f32 %v3329_v19, %v4087_v61  ;;  %v1499_v54 = vmul.f32 %v3331_v20, %v866_v52  ;;  %p2916_p6 = por %p2915_p5, %p2914_p4 }
 0x1c6   : > { %v1770_v17 = vadd.f32 %v1720_v63, %v1630_v15  ;;  %v1285_v1 = vsel %vm960_vm1, %v1283_v32, %v1284_v22  ;;  %v1331_v33 = vadd.f32 %v1283_v32, %v1223_v53  ;;  %v1910_v25 = vsel %vm1877_vm4, %v1908_v62, %v1909_v36 }
 0x1c7   : > { %v1224_v31 = vadd.f32 %v1200_v56, %v1172_v38  ;;  %v1421_v29 = vrot.slane %v1359_v26, 2  ;;  %v1422_v37 = vrot.slane %v1360_v18, 2  ;;  %2733 = vmatprep.mubr.f32.mxu1 %v1910_v25  ;;  %v1500_v41 = vmul.f32 %v3331_v20, %v867_v2  ;;  %p2917_p7 = pnand %p2916_p6, %p2910_p2 }
 0x1c8   : > { %v1801_v49 = vadd.f32 %v4096_v51, %v1770_v17  ;;  %v1544_v7 = vmul.f32 %v3338_v24, %v867_v2  ;;  %v1545_v19 = vmul.f32 %v3338_v24, %v868_v28  ;;  %v1659_v45 = vmul.f32 %v4004_v6, %v867_v2 }
 0x1c9   : > { %v1332_v46 = vadd.f32 %v1285_v1, %v1224_v31  ;;  %v1423_v60 = vsel %vm1085_vm2, %v1421_v29, %v1422_v37  ;;  %v1471_v40 = vadd.f32 %v1421_v29, %v1331_v33  ;;  %v1660_v9 = vmul.f32 %v4004_v6, %v868_v28 }
 0x1ca   : > { %v1825_v39 = vmax.f32 %v1801_v49, 0.0  ;;  %v1583_v55 = vrot.slane %v1544_v7, 1  ;;  %v1584_v59 = vrot.slane %v1545_v19, 1  ;;  %v1721_v23 = vrot.slane %v1659_v45, 2 }
 0x1cb   : > { %v1472_v58 = vadd.f32 %v1423_v60, %v1332_v46  ;;  %v1523_v44 = vadd.f32 %v1499_v54, %v1471_v40  ;;  %v899_v3 = vmul.f32 %v3313_v11, %v3990_v35  ;;  %v1722_v56 = vrot.slane %v1660_v9, 2  ;;  %v4200_v40 = vld [vmem:[%s4318_s6] ss:$0 sm:$0xff] }
 0x1cc   : > { %v1849_v10 = vmin.f32 %v1825_v39, 6.0  ;;  %v1585_v24 = vsel %vm960_vm1, %v1583_v55, %v1584_v59  ;;  %v1125_v43 = vsel %vm1085_vm2, %v1122_v16, %v1124_v57  ;;  %v1201_v34 = vmul.f32 %v3319_v14, %v4087_v61 }
 0x1cd   : > { %v1524_v63 = vadd.f32 %v1500_v41, %v1472_v58  ;;  %v1631_v12 = vadd.f32 %v1583_v55, %v1523_v44  ;;  %v1032_v4 = vadd.f32 %v983_v50, %v899_v3  ;;  %v1424_v48 = vrot.slane %v4118_v47, 2 }
 0x1ce   : > { %v1911_v13 = vrot.slane %v1849_v10, 7  ;;  %v1723_v11 = vsel %vm1085_vm2, %v1721_v23, %v1722_v56  ;;  %v1661_v27 = vmul.f32 %v4004_v6, %v869_v0  ;;  %v1501_v52 = vmul.f32 %v3331_v20, %v868_v28 }
 0x1cf   : > { %v1632_v35 = vadd.f32 %v1585_v24, %v1524_v63  ;;  %v1771_v8 = vadd.f32 %v1721_v23, %v1631_v12  ;;  %v1173_v5 = vadd.f32 %v1125_v43, %v1032_v4  ;;  %v1425_v62 = vsel %vm1085_vm2, %v1422_v37, %v1424_v48 }
 0x1d0   : > { %v1912_v42 = vsel %vm1877_vm4, %v1909_v36, %v1911_v13  ;;  %v1724_v21 = vrot.slane %v1661_v27, 2 }
 0x1d1   : > { %2734 = vmatmul.mubr.f32.gmra.mrb[12].mxu1 %v1912_v42  ;;  %v1772_v57 = vadd.f32 %v1723_v11, %v1632_v35  ;;  %v1802_v16 = vadd.f32 %v4096_v51, %v1771_v8  ;;  %v1225_v50 = vadd.f32 %v1201_v34, %v1173_v5 }
 0x1d2   : > { %v1725_v2 = vsel %vm1085_vm2, %v1722_v56, %v1724_v21 }
 0x1d3   : > { %v1803_v14 = vadd.f32 %v4096_v51, %v1772_v57  ;;  %v1826_v61 = vmax.f32 %v1802_v16, 0.0  ;;  %v1333_v47 = vadd.f32 %v1284_v22, %v1225_v50 }
 0x1d5   : > { %v1827_v30 = vmax.f32 %v1803_v14, 0.0  ;;  %v1850_v15 = vmin.f32 %v1826_v61, 6.0  ;;  %v1473_v53 = vadd.f32 %v1425_v62, %v1333_v47 }
 0x1d7   : > { %v1851_v32 = vmin.f32 %v1827_v30, 6.0  ;;  %v1913_v36 = vrot.slane %v1850_v15, 7  ;;  %v1525_v6 = vadd.f32 %v1501_v52, %v1473_v53 }
 0x1d9   : > { %v1914_v38 = vrot.slane %v1851_v32, 7  ;;  %v1633_v26 = vadd.f32 %v1584_v59, %v1525_v6 }
 0x1db   : > { %v1915_v18 = vsel %vm1877_vm4, %v1913_v36, %v1914_v38  ;;  %v1773_v17 = vadd.f32 %v1725_v2, %v1633_v26 }
 0x1dc   : > { %2736 = vmatprep.mubr.f32.mxu1 %v1915_v18 }
 0x1dd   : > { %v1804_v1 = vadd.f32 %v4096_v51, %v1773_v17 }
 0x1df   : > { %v1828_v22 = vmax.f32 %v1804_v1, 0.0 }
 0x1e1   : > { %v1852_v33 = vmin.f32 %v1828_v22, 6.0 }
 0x1e3   : > { %v1916_v20 = vrot.slane %v1852_v33, 7 }
 0x1e5   : > { %v1917_v28 = vsel %vm1877_vm4, %v1914_v38, %v1916_v20 }
 0x1e6   : > { %2737 = vmatmul.mubr.f32.gmra.mrb[14].mxu1 %v1917_v28 }
 0x200   : > { %v2743_v54 = vpop.f32.mrb[0].mxu0 }
 0x201   : > { %v2236_v25 = vpop.f32.mrb[1].mxu0 }
 0x204   : > { %v2746_v31 = vpop.f32.mrb[2].mxu0 }
 0x205   : > { %v2246_v29 = vpop.f32.mrb[3].mxu0 }
 0x208   : > { %v2749_v37 = vpop.f32.mrb[4].mxu0 }
 0x209   : > { %v2256_v49 = vpop.f32.mrb[5].mxu0 }
 0x20c   : > { %v2752_v41 = vpop.f32.mrb[6].mxu0 }
 0x20d   : > { %v2266_v7 = vpop.f32.mrb[7].mxu0 }
 0x210   : > { %v2755_v19 = vpop.f32.mrb[8].mxu0 }
 0x211   : > { %v2276_v46 = vpop.f32.mrb[9].mxu0 }
 0x214   : > { %v4193_v60 = vpop.f32.mrb[10].mxu0 }
 0x215   : > { %v4195_v51 = vpop.f32.mrb[11].mxu0 }
 0x223   : > { %v4204_v9 = vpop.f32.mrb[12].mxu0 }
 0x224   : > { %v2717_v45 = vpop.f32.mrb[0].mxu1  ;;  %v4207_v56 = vpop.f32.mrb[13].mxu0 }
 0x225   : > { %v2029_v39 = vadd.f32 %v2717_v45, %v4200_v40  ;;  %v2023_v55 = vpop.f32.mrb[1].mxu1 }
 0x226   : > { %v2024_v59 = vadd.f32 %v4200_v40, %v2023_v55 }
 0x227   : > { %v2316_v58 = vadd.f32 %v2743_v54, %v2029_v39 }
 0x228   : > { %v2315_v44 = vadd.f32 %v2236_v25, %v2024_v59 }
 0x229   : > { %v2332_v23 = vmax.f32 %v2316_v58, 0.0 }
 0x22a   : > { %v2331_v3 = vmax.f32 %v2315_v44, 0.0 }
 0x22b   : > { %v2348_v10 = vmin.f32 %v2332_v23, 6.0 }
 0x22c   : > { %v2347_v24 = vmin.f32 %v2331_v3, 6.0 }
 0x22d   : > { %2364 = vst [vmem:[%s3133_s17 + $0x8] sm:$0xff] %v2348_v10 }
 0x22e   : > { %2363 = vst [vmem:[%s3133_s17] sm:$0xff] %v2347_v24 }
 0x238   : > { %v4210_v43 = vpop.f32.mrb[14].mxu0 }
 0x239   : > { %v4212_v12 = vpop.f32.mrb[15].mxu0 }
 0x23b   : > { %v2720_v63 = vpop.f32.mrb[2].mxu1 }
 0x23c   : > { %v2039_v0 = vadd.f32 %v2720_v63, %v4200_v40  ;;  %v2033_v4 = vpop.f32.mrb[3].mxu1 }
 0x23d   : > { %v2034_v34 = vadd.f32 %v4200_v40, %v2033_v4 }
 0x23e   : > { %v2318_v48 = vadd.f32 %v2746_v31, %v2039_v0 }
 0x23f   : > { %v2317_v13 = vadd.f32 %v2246_v29, %v2034_v34 }
 0x240   : > { %v2334_v11 = vmax.f32 %v2318_v48, 0.0 }
 0x241   : > { %v2333_v35 = vmax.f32 %v2317_v13, 0.0 }
 0x242   : > { %v2350_v8 = vmin.f32 %v2334_v11, 6.0 }
 0x243   : > { %v2349_v5 = vmin.f32 %v2333_v35, 6.0 }
 0x244   : > { %2366 = vst [vmem:[%s3133_s17 + $0x18] sm:$0xff] %v2350_v8 }
 0x245   : > { %2365 = vst [vmem:[%s3133_s17 + $0x10] sm:$0xff] %v2349_v5 }
 0x250   : > { %v2723_v42 = vpop.f32.mrb[4].mxu1 }
 0x251   : > { %v2049_v27 = vadd.f32 %v2723_v42, %v4200_v40  ;;  %v2043_v57 = vpop.f32.mrb[5].mxu1 }
 0x252   : > { %v2044_v16 = vadd.f32 %v4200_v40, %v2043_v57 }
 0x253   : > { %v2320_v50 = vadd.f32 %v2749_v37, %v2049_v27 }
 0x254   : > { %v2319_v62 = vadd.f32 %v2256_v49, %v2044_v16 }
 0x255   : > { %v2336_v14 = vmax.f32 %v2320_v50, 0.0 }
 0x256   : > { %v2335_v61 = vmax.f32 %v2319_v62, 0.0 }
 0x257   : > { %v2352_v47 = vmin.f32 %v2336_v14, 6.0 }
 0x258   : > { %v2351_v52 = vmin.f32 %v2335_v61, 6.0 }
 0x259   : > { %2368 = vst [vmem:[%s3133_s17 + $0x28] sm:$0xff] %v2352_v47 }
 0x25a   : > { %2367 = vst [vmem:[%s3133_s17 + $0x20] sm:$0xff] %v2351_v52 }
 0x266   : > { %v2726_v21 = vpop.f32.mrb[6].mxu1 }
 0x267   : > { %v2059_v30 = vadd.f32 %v2726_v21, %v4200_v40  ;;  %v2053_v15 = vpop.f32.mrb[7].mxu1 }
 0x268   : > { %v2054_v53 = vadd.f32 %v4200_v40, %v2053_v15 }
 0x269   : > { %v2322_v32 = vadd.f32 %v2752_v41, %v2059_v30 }
 0x26a   : > { %v2321_v36 = vadd.f32 %v2266_v7, %v2054_v53 }
 0x26b   : > { %v2338_v6 = vmax.f32 %v2322_v32, 0.0 }
 0x26c   : > { %v2337_v2 = vmax.f32 %v2321_v36, 0.0 }
 0x26d   : > { %v2354_v38 = vmin.f32 %v2338_v6, 6.0 }
 0x26e   : > { %v2353_v26 = vmin.f32 %v2337_v2, 6.0 }
 0x26f   : > { %2370 = vst [vmem:[%s3133_s17 + $0x38] sm:$0xff] %v2354_v38 }
 0x270   : > { %2369 = vst [vmem:[%s3133_s17 + $0x30] sm:$0xff] %v2353_v26 }
 0x27b   : > { %v2729_v18 = vpop.f32.mrb[8].mxu1 }
 0x27c   : > { %v2069_v17 = vadd.f32 %v2729_v18, %v4200_v40  ;;  %v2063_v1 = vpop.f32.mrb[9].mxu1 }
 0x27d   : > { %v2064_v22 = vadd.f32 %v4200_v40, %v2063_v1 }
 0x27e   : > { %v2324_v33 = vadd.f32 %v2755_v19, %v2069_v17 }
 0x27f   : > { %v2323_v20 = vadd.f32 %v2276_v46, %v2064_v22 }
 0x280   : > { %v2340_v28 = vmax.f32 %v2324_v33, 0.0 }
 0x281   : > { %v2339_v54 = vmax.f32 %v2323_v20, 0.0 }
 0x282   : > { %v2356_v25 = vmin.f32 %v2340_v28, 6.0 }
 0x283   : > { %v2355_v31 = vmin.f32 %v2339_v54, 6.0 }
 0x284   : > { %2372 = vst [vmem:[%s3133_s17 + $0x48] sm:$0xff] %v2356_v25 }
 0x285   : > { %2371 = vst [vmem:[%s3133_s17 + $0x40] sm:$0xff] %v2355_v31 }
 0x291   : > { %v2732_v29 = vpop.f32.mrb[10].mxu1 }
 0x292   : > { %v2079_v37 = vadd.f32 %v2732_v29, %v4200_v40  ;;  %v2073_v49 = vpop.f32.mrb[11].mxu1 }
 0x293   : > { %v2074_v41 = vadd.f32 %v4200_v40, %v2073_v49 }
 0x294   : > { %v2326_v7 = vadd.f32 %v4193_v60, %v2079_v37 }
 0x295   : > { %v2325_v45 = vadd.f32 %v4195_v51, %v2074_v41 }
 0x296   : > { %v2342_v19 = vmax.f32 %v2326_v7, 0.0 }
 0x297   : > { %v2341_v46 = vmax.f32 %v2325_v45, 0.0 }
 0x298   : > { %v2358_v39 = vmin.f32 %v2342_v19, 6.0 }
 0x299   : > { %v2357_v55 = vmin.f32 %v2341_v46, 6.0 }
 0x29a   : > { %2374 = vst [vmem:[%s3133_s17 + $0x58] sm:$0xff] %v2358_v39 }
 0x29b   : > { %2373 = vst [vmem:[%s3133_s17 + $0x50] sm:$0xff] %v2357_v55 }
 0x2a4   : > { %v2735_v59 = vpop.f32.mrb[12].mxu1 }
 0x2a5   : > { %v2089_v58 = vadd.f32 %v2735_v59, %v4200_v40  ;;  %v2083_v44 = vpop.f32.mrb[13].mxu1 }
 0x2a6   : > { %v2084_v23 = vadd.f32 %v4200_v40, %v2083_v44 }
 0x2a7   : > { %v2328_v60 = vadd.f32 %v4204_v9, %v2089_v58 }
 0x2a8   : > { %v2327_v51 = vadd.f32 %v4207_v56, %v2084_v23 }
 0x2a9   : > { %v2344_v3 = vmax.f32 %v2328_v60, 0.0 }
 0x2aa   : > { %v2343_v10 = vmax.f32 %v2327_v51, 0.0 }
 0x2ab   : > { %v2360_v24 = vmin.f32 %v2344_v3, 6.0 }
 0x2ac   : > { %v2359_v63 = vmin.f32 %v2343_v10, 6.0 }
 0x2ad   : > { %2376 = vst [vmem:[%s3133_s17 + $0x68] sm:$0xff] %v2360_v24 }
 0x2ae   : > { %2375 = vst [vmem:[%s3133_s17 + $0x60] sm:$0xff] %v2359_v63 }
 0x2b9   : > { %v2738_v0 = vpop.f32.mrb[14].mxu1 }
 0x2ba   : > { %v2099_v4 = vadd.f32 %v2738_v0, %v4200_v40  ;;  %v2093_v34 = vpop.f32.mrb[15].mxu1 }
 0x2bb   : > { %v2094_v9 = vadd.f32 %v4200_v40, %v2093_v34 }
 0x2bc   : > { %v2330_v56 = vadd.f32 %v4210_v43, %v2099_v4 }
 0x2bd   : > { %v2329_v48 = vadd.f32 %v4212_v12, %v2094_v9 }
 0x2be   : > { %v2346_v13 = vmax.f32 %v2330_v56, 0.0 }
 0x2bf   : > { %v2345_v11 = vmax.f32 %v2329_v48, 0.0 }
 0x2c0   : > { %v2362_v35 = vmin.f32 %v2346_v13, 6.0 }
 0x2c1   : > { %v2361_v40 = vmin.f32 %v2345_v11, 6.0 }
 0x2c2   : > { %2378 = vst [vmem:[%s3133_s17 + $0x78] sm:$0xff] %v2362_v35 }
 0x2c3   : > { %2377 = vst [vmem:[%s3133_s17 + $0x70] sm:$0xff] %v2361_v40 }
 0x2c4   : > { %2920 = shalt.err (!%p2917_p7)
}
 0x2c5   : > { %s2921_s17 = scalar_lea.hbm %s4252_s22, 2048  ;;  %s2925_s15 = scalar_lea.hbm %s4320_s8, 8192 }
 0x2c6   : > { %p2922_p9 = scmp.ne.s32.totalorder %s4252_s22, %s2921_s17  ;;  %p2926_p12 = scmp.lt.u32.totalorder %s4252_s22, %s4320_s8 }
 0x2c7   : > { %p2927_p13 = scmp.lt.u32.totalorder %s2925_s15, %s2921_s17  ;;  %p2929_p1 = scmp.lt.u32.totalorder %s2921_s17, %s4252_s22 }
 0x2c8   : > { %p2923_p10 = pnand %p2922_p9, %p3103_p3 }
 0x2c9   : > { %p2928_p0 = por %p2927_p13, %p2926_p12 }
 0x2ca   : > { %p2924_p11 = pneg %p2923_p10 }
 0x2cb   : > { %p2930_p2 = por %p2929_p1, %p2928_p0 }
 0x2cd   : > { %p2931_p4 = pnand %p2930_p2, %p2924_p11 }
 0x2cf   : > { %2934 = shalt.err (!%p2931_p4)
}
 0x2d0   : > { %s3005_s30 = smov 128   ;;  %s3006_s9 = smov 8  }
 0x2d1   : > { %2831 = dma.vmem_to_hbm [thread:$0]  (%p3103_p3), %s4254_s21, 2048, %s4252_s22, %s4260_s24, %s3005_s30, %s3005_s30, %s3006_s9  }
 0x2d2 PF: > { %p2837_p5 = scmp.ge.s32.totalorder %s3001_s12, 2  ;;  %s2411_s0 = sand.u32 1, %s2973_s27  }
 0x2d3   : > { %s2412_s25 = scalar_lea.sflag [#allocation4], %s2411_s0 }
 0x2d4   : > { %p2834_p6 = pnand %p2837_p5, %p3112_p8 }
 0x2d6   : > { %2968 = dma.done.wait (!%p2834_p6), %s2412_s25, 2048  }
 0x2d7   : > { %2970 = vsyncadd (!%p2834_p6), %s2412_s25, 4294965248  ;;  %s21_s12 = sadd.s32 1, %s3001_s12   ;;  %s4335_s18 = sld [smem:[#allocation6_spill]] }
 0x2d8   : > { %p18_p7 = scmp.ge.s32.totalorder %s21_s12, 6   ;;  %s4336_s21 = sld [smem:[#allocation7_spill]] }
 0x2d9   : > { %s4337_s27 = smov %s2977_s28  ;;  %s4338_s28 = smov %s2981_s29 }
 0x2da   : > { %s4339_s29 = smov %s3121_s23  ;;  %s4340_s30 = smov %s2993_s10 }
 0x2db   : > { %s4341_s9 = smov %s2997_s11  ;;  %20 = sbr.rel (!%p18_p7) target bundleno = 9 (0x9), region = 95 }
 0x2dd   : > { %s4342_s10 = smov %s4335_s18 }
 0x2de   : > { %s4343_s11 = smov %s4336_s21 }
 0x2e2   :  { %2417 = vsyncpa [#allocation4], 1 }
 0x2e3   :  { %2419 = vsyncpa [#allocation4 + $0x1], 1 }

</bundles_post_ra>
